<compile_context>
chip_gen: v5e
topology: v5e:2x2
jax: 0.10.0
libtpu: 0.0.40
codegen_flags: <defaults>
</compile_context>

<pallas_src>
import jax
import jax.numpy as jnp
from jax import lax
from jax.experimental import pallas as pl
from jax.experimental.pallas import tpu as pltpu


_VMEM_LIMIT = 48 * 1024 * 1024   # > scoped defaults, < v7x 64 MiB physical
_LEAKY_SLOPE = 0.2
_BN_EPS = 1e-5


def _round_up(x, m):
    return -(-x // m) * m


def _conv_out_hw(h, w, k, s, p):
    return (h + 2 * p - k) // s + 1, (w + 2 * p - k) // s + 1


# ----------------------------------------------------------------------------
# Kernel 1a: transposed conv-GEMM with fused bias (+ optional LeakyReLU).
#   y[Cout, tm] = W^T[Cout, K] @ A^T[K, tm] + b ; epilogue in f32, cast at store.
# ----------------------------------------------------------------------------
def _make_conv_bias_kernel(apply_leaky):
    def kernel(w_ref, a_ref, b_ref, o_ref):
        y = jnp.dot(w_ref[...], a_ref[...], preferred_element_type=jnp.float32)
        y = y + b_ref[...]
        if apply_leaky:
            y = jnp.where(y >= 0, y, _LEAKY_SLOPE * y)
        o_ref[...] = y.astype(o_ref.dtype)
    return kernel


def conv_gemm_bias(wt, at, b_col, *, apply_leaky, out_dtype, tm):
    Np, Kp = wt.shape
    _, Mp = at.shape
    nt = Mp // tm
    return pl.pallas_call(
        _make_conv_bias_kernel(apply_leaky),
        out_shape=jax.ShapeDtypeStruct((Np, Mp), out_dtype),
        grid_spec=pltpu.PrefetchScalarGridSpec(
            num_scalar_prefetch=0,
            grid=(nt,),
            in_specs=[
                pl.BlockSpec((Np, Kp), lambda i: (0, 0)),
                pl.BlockSpec((Kp, tm), lambda i: (0, i)),
                pl.BlockSpec((Np, 1), lambda i: (0, 0)),
            ],
            out_specs=pl.BlockSpec((Np, tm), lambda i: (0, i)),
        ),
        compiler_params=pltpu.CompilerParams(
            dimension_semantics=("parallel",),
            vmem_limit_bytes=_VMEM_LIMIT,
        ),
    )(wt, at, b_col)


# ----------------------------------------------------------------------------
# Kernel 1b: transposed conv-GEMM (no bias) that also emits per-tile channel
# sum and sum-of-squares (BatchNorm stats fused into the matmul epilogue).
# Padded M lanes are exact zeros (zero A columns, no bias), so they do not
# perturb the statistics.
# ----------------------------------------------------------------------------
def _conv_stats_kernel(w_ref, a_ref, y_ref, sum_ref, sq_ref):
    y = jnp.dot(w_ref[...], a_ref[...], preferred_element_type=jnp.float32)
    y_ref[...] = y
    s = jnp.sum(y, axis=1, keepdims=True)
    q = jnp.sum(y * y, axis=1, keepdims=True)
    sum_ref[...] = jnp.broadcast_to(s, sum_ref.shape)
    sq_ref[...] = jnp.broadcast_to(q, sq_ref.shape)


def conv_gemm_stats(wt, at, *, tm):
    Np, Kp = wt.shape
    _, Mp = at.shape
    nt = Mp // tm
    return pl.pallas_call(
        _conv_stats_kernel,
        out_shape=(
            jax.ShapeDtypeStruct((Np, Mp), jnp.float32),
            jax.ShapeDtypeStruct((Np, nt * 128), jnp.float32),
            jax.ShapeDtypeStruct((Np, nt * 128), jnp.float32),
        ),
        grid_spec=pltpu.PrefetchScalarGridSpec(
            num_scalar_prefetch=0,
            grid=(nt,),
            in_specs=[
                pl.BlockSpec((Np, Kp), lambda i: (0, 0)),
                pl.BlockSpec((Kp, tm), lambda i: (0, i)),
            ],
            out_specs=[
                pl.BlockSpec((Np, tm), lambda i: (0, i)),
                pl.BlockSpec((Np, 128), lambda i: (0, i)),
                pl.BlockSpec((Np, 128), lambda i: (0, i)),
            ],
        ),
        compiler_params=pltpu.CompilerParams(
            dimension_semantics=("parallel",),
            vmem_limit_bytes=_VMEM_LIMIT,
        ),
    )(wt, at)


# ----------------------------------------------------------------------------
# Kernel 2: gridded BatchNorm-apply + LeakyReLU:  out = leaky(y*scale + shift)
# (scale/shift are per-channel, precomputed from the fused statistics).
# ----------------------------------------------------------------------------
def _bn_leaky_apply_kernel(y_ref, s_ref, t_ref, o_ref):
    z = y_ref[...] * s_ref[...] + t_ref[...]
    o_ref[...] = jnp.where(z >= 0, z, _LEAKY_SLOPE * z).astype(o_ref.dtype)


def bn_leaky_apply(y, scale, shift, *, tm, out_dtype):
    Np, Mp = y.shape
    nt = Mp // tm
    return pl.pallas_call(
        _bn_leaky_apply_kernel,
        out_shape=jax.ShapeDtypeStruct((Np, Mp), out_dtype),
        grid_spec=pltpu.PrefetchScalarGridSpec(
            num_scalar_prefetch=0,
            grid=(nt,),
            in_specs=[
                pl.BlockSpec((Np, tm), lambda i: (0, i)),
                pl.BlockSpec((Np, 1), lambda i: (0, 0)),
                pl.BlockSpec((Np, 1), lambda i: (0, 0)),
            ],
            out_specs=pl.BlockSpec((Np, tm), lambda i: (0, i)),
        ),
        compiler_params=pltpu.CompilerParams(
            dimension_semantics=("parallel",),
            vmem_limit_bytes=_VMEM_LIMIT,
        ),
    )(y, scale.reshape(Np, 1).astype(jnp.float32),
      shift.reshape(Np, 1).astype(jnp.float32))


# ----------------------------------------------------------------------------
# Glue: transposed im2col (A^T [K, M], K on sublanes, M on lanes), bf16.
# ----------------------------------------------------------------------------
def im2col_t(x_cnhw, kh, kw, stride, pad, mp):
    C, N, H, W = x_cnhw.shape
    Ho, Wo = _conv_out_hw(H, W, kh, stride, pad)
    xp = jnp.pad(x_cnhw, ((0, 0), (0, 0), (pad, pad), (pad, pad)))
    cols = []
    for i in range(kh):
        for j in range(kw):
            cols.append(lax.slice(
                xp, (0, 0, i, j),
                (C, N, i + stride * (Ho - 1) + 1, j + stride * (Wo - 1) + 1),
                (1, 1, stride, stride)))  # [C, N, Ho, Wo]
    K = kh * kw * C
    M = N * Ho * Wo
    at = jnp.stack(cols, axis=0).reshape(K, M).astype(jnp.bfloat16)
    Kp = _round_up(K, 8)
    at = jnp.pad(at, ((0, Kp - K), (0, mp - M)))
    return at


def build_params(key, input_nc=4, ndf=8, n_layers=3):
    """Synthetic params; mirrors NLayerDiscriminator.__init__ shapes.
    Weights/bias are pre-transposed / pre-padded / pre-cast for the kernels."""
    kw = 4
    defs = [(input_nc, ndf, 2, True, False, True)]
    nf_mult = 1
    for n in range(1, n_layers):
        nf_prev, nf_mult = nf_mult, min(2 ** n, 8)
        defs.append((ndf * nf_prev, ndf * nf_mult, 2, False, True, True))
    nf_prev, nf_mult = nf_mult, min(2 ** n_layers, 8)
    defs.append((ndf * nf_prev, ndf * nf_mult, 1, False, True, True))
    defs.append((ndf * nf_mult, 1, 1, True, False, False))

    params = []
    for (cin, cout, stride, has_bias, has_norm, has_leaky) in defs:
        key, kw_key, kb_key = jax.random.split(key, 3)
        w_oihw = 0.05 * jax.random.normal(kw_key, (cout, cin, kw, kw), jnp.float32)
        b = (0.05 * jax.random.normal(kb_key, (cout,), jnp.float32)
             if has_bias else jnp.zeros((cout,), jnp.float32))
        gamma = jnp.ones((cout,), jnp.float32)
        beta = jnp.zeros((cout,), jnp.float32)

        K = kw * kw * cin
        Kp = _round_up(K, 8)
        Np = _round_up(cout, 8)
        # W^T[Cout, K]; K ordering ((i*kw + j)*Cin + cin) matches im2col_t.
        wt = jnp.transpose(w_oihw, (0, 2, 3, 1)).reshape(cout, K)
        wt = jnp.pad(wt, ((0, Np - cout), (0, Kp - K))).astype(jnp.bfloat16)
        b_col = jnp.pad(b.reshape(cout, 1), ((0, Np - cout), (0, 0)))
        gamma_p = jnp.pad(gamma, (0, Np - cout), constant_values=1.0)
        beta_p = jnp.pad(beta, (0, Np - cout))

        params.append(dict(
            w_oihw=w_oihw, b=b, gamma=gamma, beta=beta,          # reference path
            wt=wt, b_col=b_col, gamma_p=gamma_p, beta_p=beta_p,  # pallas path
            stride=stride, cout=cout, Np=Np,
            has_bias=has_bias, has_norm=has_norm, has_leaky=has_leaky))
    return params


def nlayer_discriminator_forward(x_nchw, params, *, tm=128):
    """Pallas-backed forward. Input/output NCHW to match PyTorch.
    For production-scale inputs raise tm to 256-512 (larger on v5e/v6e,
    capped on v7x's 64 MiB VMEM)."""
    kw, pad = 4, 2
    N = x_nchw.shape[0]
    x = jnp.transpose(x_nchw, (1, 0, 2, 3)).astype(jnp.float32)  # [C, N, H, W]
    n_total = len(params)
    for li, p in enumerate(params):
        _, _, H, W = x.shape
        Ho, Wo = _conv_out_hw(H, W, kw, p["stride"], pad)
        M = N * Ho * Wo
        tm_eff = min(tm, _round_up(M, 128))
        Mp = _round_up(M, tm_eff)
        at = im2col_t(x, kw, kw, p["stride"], pad, Mp)
        Np = p["Np"]

        if p["has_norm"]:
            y, sums, sqs = conv_gemm_stats(p["wt"], at, tm=tm_eff)
            nt = Mp // tm_eff
            ssum = sums.reshape(Np, nt, 128)[:, :, 0].sum(axis=1)
            ssq = sqs.reshape(Np, nt, 128)[:, :, 0].sum(axis=1)
            cnt = jnp.float32(M)
            mean = ssum / cnt
            var = jnp.maximum(ssq / cnt - mean * mean, 0.0)   # biased var (train mode)
            inv = lax.rsqrt(var + _BN_EPS)
            scale = p["gamma_p"] * inv
            shift = p["beta_p"] - mean * scale
            y = bn_leaky_apply(y, scale, shift, tm=tm_eff, out_dtype=jnp.bfloat16)
        else:
            is_last = li == n_total - 1
            out_dtype = jnp.float32 if is_last else jnp.bfloat16
            y = conv_gemm_bias(p["wt"], at, p["b_col"],
                               apply_leaky=p["has_leaky"],
                               out_dtype=out_dtype, tm=tm_eff)

        x = y[:p["cout"], :M].reshape(p["cout"], N, Ho, Wo)
    return jnp.transpose(x, (1, 0, 2, 3)).astype(jnp.float32)   # -> NCHW


def reference_forward(x_nchw, params):
    """Pure-JAX (XLA conv, f32 HIGHEST) reference for validation."""
    x = x_nchw.astype(jnp.float32)
    for p in params:
        x = lax.conv_general_dilated(
            x, p["w_oihw"], (p["stride"], p["stride"]), [(2, 2), (2, 2)],
            dimension_numbers=("NCHW", "OIHW", "NCHW"),
            precision=lax.Precision.HIGHEST)
        if p["has_bias"]:
            x = x + p["b"].reshape(1, -1, 1, 1)
        if p["has_norm"]:
            mean = jnp.mean(x, axis=(0, 2, 3), keepdims=True)
            var = jnp.mean((x - mean) ** 2, axis=(0, 2, 3), keepdims=True)
            x = (x - mean) * lax.rsqrt(var + _BN_EPS)
            x = x * p["gamma"].reshape(1, -1, 1, 1) + p["beta"].reshape(1, -1, 1, 1)
        if p["has_leaky"]:
            x = jnp.where(x >= 0, x, _LEAKY_SLOPE * x)
    return x


if __name__ == "__main__":
    key = jax.random.PRNGKey(0)
    key, xkey = jax.random.split(key)

    B, C_IN, H, W = 2, 4, 16, 16
    NDF, N_LAYERS = 8, 3

    x = jax.random.normal(xkey, (B, C_IN, H, W), jnp.float32)
    params = build_params(key, input_nc=C_IN, ndf=NDF, n_layers=N_LAYERS)

    fwd = jax.jit(lambda inp: nlayer_discriminator_forward(inp, params))
    out = jax.block_until_ready(fwd(x))
    ref = jax.block_until_ready(reference_forward(x, params))

    assert out.shape == ref.shape, (out.shape, ref.shape)
    assert bool(jnp.all(jnp.isfinite(out)))
    max_err = float(jnp.max(jnp.abs(out - ref)))
    assert max_err < 5e-2, f"max abs error too large: {max_err}"

    print("KERNEL_OK")
</pallas_src>

<mosaic_0001>
module attributes {stable_mosaic.version = 11 : i64} {
  func.func @kernel(%arg0: i32, %arg1: memref<8x64xbf16, #tpu.memory_space<vmem>>, %arg2: memref<64x128xbf16, #tpu.memory_space<vmem>>, %arg3: memref<8x1xf32, #tpu.memory_space<vmem>>, %arg4: memref<8x128xbf16, #tpu.memory_space<vmem>>) attributes {dimension_semantics = [#tpu.dimension_semantics<parallel>], iteration_bounds = array<i64: 2>, scalar_prefetch = 0 : i64, scratch_operands = 0 : i64, tpu.core_type = #tpu.core_type<tc>, window_params = [{pipeline_mode = #tpu.pipeline_mode<synchronous>, transform_indices = @transform_0, window_bounds = array<i64: 8, 64>}, {transform_indices = @transform_1, window_bounds = array<i64: 64, 128>}, {pipeline_mode = #tpu.pipeline_mode<synchronous>, transform_indices = @transform_2, window_bounds = array<i64: 8, 1>}, {transform_indices = @transform_3, window_bounds = array<i64: 8, 128>}]} {
    %c0 = arith.constant 0 : index
    %c0_0 = arith.constant 0 : index
    %0 = vector.load %arg1[%c0, %c0_0] : memref<8x64xbf16, #tpu.memory_space<vmem>>, vector<8x64xbf16>
    %c0_1 = arith.constant 0 : index
    %c0_2 = arith.constant 0 : index
    %1 = vector.load %arg2[%c0_1, %c0_2] : memref<64x128xbf16, #tpu.memory_space<vmem>>, vector<64x128xbf16>
    %cst = arith.constant dense<0.000000e+00> : vector<8x128xf32>
    %2 = tpu.matmul %0, %1, %cst {dimension_numbers = #tpu.dot_dimension_numbers<[1], [0], [0], [1], [0, 0, 1, 1], [], []>} : vector<8x64xbf16>, vector<64x128xbf16>, vector<8x128xf32> -> vector<8x128xf32>
    %c0_3 = arith.constant 0 : index
    %c0_4 = arith.constant 0 : index
    %3 = vector.load %arg3[%c0_3, %c0_4] : memref<8x1xf32, #tpu.memory_space<vmem>>, vector<8x1xf32>
    %4 = vector.broadcast %3 : vector<8x1xf32> to vector<8x128xf32>
    %5 = arith.addf %2, %4 : vector<8x128xf32>
    %cst_5 = arith.constant 0.000000e+00 : f32
    %6 = vector.broadcast %cst_5 : f32 to vector<8x128xf32>
    %7 = arith.cmpf oge, %5, %6 : vector<8x128xf32>
    %cst_6 = arith.constant 2.000000e-01 : f32
    %8 = vector.broadcast %cst_6 : f32 to vector<8x128xf32>
    %9 = arith.mulf %8, %5 : vector<8x128xf32>
    %10 = arith.select %7, %5, %9 : vector<8x128xi1>, vector<8x128xf32>
    %11 = arith.truncf %10 : vector<8x128xf32> to vector<8x128xbf16>
    %c0_7 = arith.constant 0 : index
    %c0_8 = arith.constant 0 : index
    %12 = vector.load %arg4[%c0_7, %c0_8] : memref<8x128xbf16, #tpu.memory_space<vmem>>, vector<8x128xbf16>
    tpu.vector_store %arg4[%c0_7, %c0_8], %11 {strides = array<i32>} : memref<8x128xbf16, #tpu.memory_space<vmem>>, vector<8x128xbf16>,
    return
  }
  func.func @transform_0(%arg0: i32) -> (i32, i32) {
    %c0_i32 = arith.constant 0 : i32
    %c0_i32_0 = arith.constant 0 : i32
    %c0_i32_1 = arith.constant 0 : i32
    return %c0_i32, %c0_i32_0 : i32, i32
  }
  func.func @transform_1(%arg0: i32) -> (i32, i32) {
    %c0_i32 = arith.constant 0 : i32
    %c0_i32_0 = arith.constant 0 : i32
    return %c0_i32, %arg0 : i32, i32
  }
  func.func @transform_2(%arg0: i32) -> (i32, i32) {
    %c0_i32 = arith.constant 0 : i32
    %c0_i32_0 = arith.constant 0 : i32
    %c0_i32_1 = arith.constant 0 : i32
    return %c0_i32, %c0_i32_0 : i32, i32
  }
  func.func @transform_3(%arg0: i32) -> (i32, i32) {
    %c0_i32 = arith.constant 0 : i32
    %c0_i32_0 = arith.constant 0 : i32
    return %c0_i32, %arg0 : i32, i32
  }
}

module attributes {stable_mosaic.version = 11 : i64} {
  func.func @_conv_stats_kernel(%arg0: i32, %arg1: memref<16x128xbf16, #tpu.memory_space<vmem>>, %arg2: memref<128x128xbf16, #tpu.memory_space<vmem>>, %arg3: memref<16x128xf32, #tpu.memory_space<vmem>>, %arg4: memref<16x128xf32, #tpu.memory_space<vmem>>, %arg5: memref<16x128xf32, #tpu.memory_space<vmem>>) attributes {dimension_semantics = [#tpu.dimension_semantics<parallel>], iteration_bounds = array<i64: 1>, scalar_prefetch = 0 : i64, scratch_operands = 0 : i64, tpu.core_type = #tpu.core_type<tc>, window_params = [{pipeline_mode = #tpu.pipeline_mode<synchronous>, transform_indices = @transform_0, window_bounds = array<i64: 16, 128>}, {transform_indices = @transform_1, window_bounds = array<i64: 128, 128>}, {transform_indices = @transform_2, window_bounds = array<i64: 16, 128>}, {transform_indices = @transform_3, window_bounds = array<i64: 16, 128>}, {transform_indices = @transform_4, window_bounds = array<i64: 16, 128>}]} {
    %c0 = arith.constant 0 : index
    %c0_0 = arith.constant 0 : index
    %0 = vector.load %arg1[%c0, %c0_0] : memref<16x128xbf16, #tpu.memory_space<vmem>>, vector<16x128xbf16>
    %c0_1 = arith.constant 0 : index
    %c0_2 = arith.constant 0 : index
    %1 = vector.load %arg2[%c0_1, %c0_2] : memref<128x128xbf16, #tpu.memory_space<vmem>>, vector<128x128xbf16>
    %cst = arith.constant dense<0.000000e+00> : vector<16x128xf32>
    %2 = tpu.matmul %0, %1, %cst {dimension_numbers = #tpu.dot_dimension_numbers<[1], [0], [0], [1], [0, 0, 1, 1], [], []>} : vector<16x128xbf16>, vector<128x128xbf16>, vector<16x128xf32> -> vector<16x128xf32>
    %c0_3 = arith.constant 0 : index
    %c0_4 = arith.constant 0 : index
    %3 = vector.load %arg3[%c0_3, %c0_4] : memref<16x128xf32, #tpu.memory_space<vmem>>, vector<16x128xf32>
    tpu.vector_store %arg3[%c0_3, %c0_4], %2 {strides = array<i32>} : memref<16x128xf32, #tpu.memory_space<vmem>>, vector<16x128xf32>,
    %cst_5 = arith.constant dense<0.000000e+00> : vector<16xf32>
    %4 = vector.multi_reduction <add>, %2, %cst_5 [1] : vector<16x128xf32> to vector<16xf32>
    %5 = vector.shape_cast %4 : vector<16xf32> to vector<16x1xf32>
    %6 = arith.mulf %2, %2 : vector<16x128xf32>
    %cst_6 = arith.constant dense<0.000000e+00> : vector<16xf32>
    %7 = vector.multi_reduction <add>, %6, %cst_6 [1] : vector<16x128xf32> to vector<16xf32>
    %8 = vector.shape_cast %7 : vector<16xf32> to vector<16x1xf32>
    %9 = vector.shape_cast %5 : vector<16x1xf32> to vector<16x1xf32>
    %10 = vector.broadcast %9 : vector<16x1xf32> to vector<16x128xf32>
    %c0_7 = arith.constant 0 : index
    %c0_8 = arith.constant 0 : index
    %11 = vector.load %arg4[%c0_7, %c0_8] : memref<16x128xf32, #tpu.memory_space<vmem>>, vector<16x128xf32>
    tpu.vector_store %arg4[%c0_7, %c0_8], %10 {strides = array<i32>} : memref<16x128xf32, #tpu.memory_space<vmem>>, vector<16x128xf32>,
    %12 = vector.shape_cast %8 : vector<16x1xf32> to vector<16x1xf32>
    %13 = vector.broadcast %12 : vector<16x1xf32> to vector<16x128xf32>
    %c0_9 = arith.constant 0 : index
    %c0_10 = arith.constant 0 : index
    %14 = vector.load %arg5[%c0_9, %c0_10] : memref<16x128xf32, #tpu.memory_space<vmem>>, vector<16x128xf32>
    tpu.vector_store %arg5[%c0_9, %c0_10], %13 {strides = array<i32>} : memref<16x128xf32, #tpu.memory_space<vmem>>, vector<16x128xf32>,
    return
  }
  func.func @transform_0(%arg0: i32) -> (i32, i32) {
    %c0_i32 = arith.constant 0 : i32
    %c0_i32_0 = arith.constant 0 : i32
    %c0_i32_1 = arith.constant 0 : i32
    return %c0_i32, %c0_i32_0 : i32, i32
  }
  func.func @transform_1(%arg0: i32) -> (i32, i32) {
    %c0_i32 = arith.constant 0 : i32
    %c0_i32_0 = arith.constant 0 : i32
    return %c0_i32, %arg0 : i32, i32
  }
  func.func @transform_2(%arg0: i32) -> (i32, i32) {
    %c0_i32 = arith.constant 0 : i32
    %c0_i32_0 = arith.constant 0 : i32
    return %c0_i32, %arg0 : i32, i32
  }
  func.func @transform_3(%arg0: i32) -> (i32, i32) {
    %c0_i32 = arith.constant 0 : i32
    %c0_i32_0 = arith.constant 0 : i32
    return %c0_i32, %arg0 : i32, i32
  }
  func.func @transform_4(%arg0: i32) -> (i32, i32) {
    %c0_i32 = arith.constant 0 : i32
    %c0_i32_0 = arith.constant 0 : i32
    return %c0_i32, %arg0 : i32, i32
  }
}

module attributes {stable_mosaic.version = 11 : i64} {
  func.func @_bn_leaky_apply_kernel(%arg0: i32, %arg1: memref<16x128xf32, #tpu.memory_space<vmem>>, %arg2: memref<16x1xf32, #tpu.memory_space<vmem>>, %arg3: memref<16x1xf32, #tpu.memory_space<vmem>>, %arg4: memref<16x128xbf16, #tpu.memory_space<vmem>>) attributes {dimension_semantics = [#tpu.dimension_semantics<parallel>], iteration_bounds = array<i64: 1>, scalar_prefetch = 0 : i64, scratch_operands = 0 : i64, tpu.core_type = #tpu.core_type<tc>, window_params = [{transform_indices = @transform_0, window_bounds = array<i64: 16, 128>}, {pipeline_mode = #tpu.pipeline_mode<synchronous>, transform_indices = @transform_1, window_bounds = array<i64: 16, 1>}, {pipeline_mode = #tpu.pipeline_mode<synchronous>, transform_indices = @transform_2, window_bounds = array<i64: 16, 1>}, {transform_indices = @transform_3, window_bounds = array<i64: 16, 128>}]} {
    %c0 = arith.constant 0 : index
    %c0_0 = arith.constant 0 : index
    %0 = vector.load %arg1[%c0, %c0_0] : memref<16x128xf32, #tpu.memory_space<vmem>>, vector<16x128xf32>
    %c0_1 = arith.constant 0 : index
    %c0_2 = arith.constant 0 : index
    %1 = vector.load %arg2[%c0_1, %c0_2] : memref<16x1xf32, #tpu.memory_space<vmem>>, vector<16x1xf32>
    %2 = vector.broadcast %1 : vector<16x1xf32> to vector<16x128xf32>
    %3 = arith.mulf %0, %2 : vector<16x128xf32>
    %c0_3 = arith.constant 0 : index
    %c0_4 = arith.constant 0 : index
    %4 = vector.load %arg3[%c0_3, %c0_4] : memref<16x1xf32, #tpu.memory_space<vmem>>, vector<16x1xf32>
    %5 = vector.broadcast %4 : vector<16x1xf32> to vector<16x128xf32>
    %6 = arith.addf %3, %5 : vector<16x128xf32>
    %cst = arith.constant 0.000000e+00 : f32
    %7 = vector.broadcast %cst : f32 to vector<16x128xf32>
    %8 = arith.cmpf oge, %6, %7 : vector<16x128xf32>
    %cst_5 = arith.constant 2.000000e-01 : f32
    %9 = vector.broadcast %cst_5 : f32 to vector<16x128xf32>
    %10 = arith.mulf %9, %6 : vector<16x128xf32>
    %11 = arith.select %8, %6, %10 : vector<16x128xi1>, vector<16x128xf32>
    %12 = arith.truncf %11 : vector<16x128xf32> to vector<16x128xbf16>
    %c0_6 = arith.constant 0 : index
    %c0_7 = arith.constant 0 : index
    %13 = vector.load %arg4[%c0_6, %c0_7] : memref<16x128xbf16, #tpu.memory_space<vmem>>, vector<16x128xbf16>
    tpu.vector_store %arg4[%c0_6, %c0_7], %12 {strides = array<i32>} : memref<16x128xbf16, #tpu.memory_space<vmem>>, vector<16x128xbf16>,
    return
  }
  func.func @transform_0(%arg0: i32) -> (i32, i32) {
    %c0_i32 = arith.constant 0 : i32
    %c0_i32_0 = arith.constant 0 : i32
    return %c0_i32, %arg0 : i32, i32
  }
  func.func @transform_1(%arg0: i32) -> (i32, i32) {
    %c0_i32 = arith.constant 0 : i32
    %c0_i32_0 = arith.constant 0 : i32
    %c0_i32_1 = arith.constant 0 : i32
    return %c0_i32, %c0_i32_0 : i32, i32
  }
  func.func @transform_2(%arg0: i32) -> (i32, i32) {
    %c0_i32 = arith.constant 0 : i32
    %c0_i32_0 = arith.constant 0 : i32
    %c0_i32_1 = arith.constant 0 : i32
    return %c0_i32, %c0_i32_0 : i32, i32
  }
  func.func @transform_3(%arg0: i32) -> (i32, i32) {
    %c0_i32 = arith.constant 0 : i32
    %c0_i32_0 = arith.constant 0 : i32
    return %c0_i32, %arg0 : i32, i32
  }
}

module attributes {stable_mosaic.version = 11 : i64} {
  func.func @_bn_leaky_apply_kernel(%arg0: i32, %arg1: memref<32x128xf32, #tpu.memory_space<vmem>>, %arg2: memref<32x1xf32, #tpu.memory_space<vmem>>, %arg3: memref<32x1xf32, #tpu.memory_space<vmem>>, %arg4: memref<32x128xbf16, #tpu.memory_space<vmem>>) attributes {dimension_semantics = [#tpu.dimension_semantics<parallel>], iteration_bounds = array<i64: 1>, scalar_prefetch = 0 : i64, scratch_operands = 0 : i64, tpu.core_type = #tpu.core_type<tc>, window_params = [{transform_indices = @transform_0, window_bounds = array<i64: 32, 128>}, {pipeline_mode = #tpu.pipeline_mode<synchronous>, transform_indices = @transform_1, window_bounds = array<i64: 32, 1>}, {pipeline_mode = #tpu.pipeline_mode<synchronous>, transform_indices = @transform_2, window_bounds = array<i64: 32, 1>}, {transform_indices = @transform_3, window_bounds = array<i64: 32, 128>}]} {
    %c0 = arith.constant 0 : index
    %c0_0 = arith.constant 0 : index
    %0 = vector.load %arg1[%c0, %c0_0] : memref<32x128xf32, #tpu.memory_space<vmem>>, vector<32x128xf32>
    %c0_1 = arith.constant 0 : index
    %c0_2 = arith.constant 0 : index
    %1 = vector.load %arg2[%c0_1, %c0_2] : memref<32x1xf32, #tpu.memory_space<vmem>>, vector<32x1xf32>
    %2 = vector.broadcast %1 : vector<32x1xf32> to vector<32x128xf32>
    %3 = arith.mulf %0, %2 : vector<32x128xf32>
    %c0_3 = arith.constant 0 : index
    %c0_4 = arith.constant 0 : index
    %4 = vector.load %arg3[%c0_3, %c0_4] : memref<32x1xf32, #tpu.memory_space<vmem>>, vector<32x1xf32>
    %5 = vector.broadcast %4 : vector<32x1xf32> to vector<32x128xf32>
    %6 = arith.addf %3, %5 : vector<32x128xf32>
    %cst = arith.constant 0.000000e+00 : f32
    %7 = vector.broadcast %cst : f32 to vector<32x128xf32>
    %8 = arith.cmpf oge, %6, %7 : vector<32x128xf32>
    %cst_5 = arith.constant 2.000000e-01 : f32
    %9 = vector.broadcast %cst_5 : f32 to vector<32x128xf32>
    %10 = arith.mulf %9, %6 : vector<32x128xf32>
    %11 = arith.select %8, %6, %10 : vector<32x128xi1>, vector<32x128xf32>
    %12 = arith.truncf %11 : vector<32x128xf32> to vector<32x128xbf16>
    %c0_6 = arith.constant 0 : index
    %c0_7 = arith.constant 0 : index
    %13 = vector.load %arg4[%c0_6, %c0_7] : memref<32x128xbf16, #tpu.memory_space<vmem>>, vector<32x128xbf16>
    tpu.vector_store %arg4[%c0_6, %c0_7], %12 {strides = array<i32>} : memref<32x128xbf16, #tpu.memory_space<vmem>>, vector<32x128xbf16>,
    return
  }
  func.func @transform_0(%arg0: i32) -> (i32, i32) {
    %c0_i32 = arith.constant 0 : i32
    %c0_i32_0 = arith.constant 0 : i32
    return %c0_i32, %arg0 : i32, i32
  }
  func.func @transform_1(%arg0: i32) -> (i32, i32) {
    %c0_i32 = arith.constant 0 : i32
    %c0_i32_0 = arith.constant 0 : i32
    %c0_i32_1 = arith.constant 0 : i32
    return %c0_i32, %c0_i32_0 : i32, i32
  }
  func.func @transform_2(%arg0: i32) -> (i32, i32) {
    %c0_i32 = arith.constant 0 : i32
    %c0_i32_0 = arith.constant 0 : i32
    %c0_i32_1 = arith.constant 0 : i32
    return %c0_i32, %c0_i32_0 : i32, i32
  }
  func.func @transform_3(%arg0: i32) -> (i32, i32) {
    %c0_i32 = arith.constant 0 : i32
    %c0_i32_0 = arith.constant 0 : i32
    return %c0_i32, %arg0 : i32, i32
  }
}

module attributes {stable_mosaic.version = 11 : i64} {
  func.func @_conv_stats_kernel(%arg0: i32, %arg1: memref<32x256xbf16, #tpu.memory_space<vmem>>, %arg2: memref<256x128xbf16, #tpu.memory_space<vmem>>, %arg3: memref<32x128xf32, #tpu.memory_space<vmem>>, %arg4: memref<32x128xf32, #tpu.memory_space<vmem>>, %arg5: memref<32x128xf32, #tpu.memory_space<vmem>>) attributes {dimension_semantics = [#tpu.dimension_semantics<parallel>], iteration_bounds = array<i64: 1>, scalar_prefetch = 0 : i64, scratch_operands = 0 : i64, tpu.core_type = #tpu.core_type<tc>, window_params = [{pipeline_mode = #tpu.pipeline_mode<synchronous>, transform_indices = @transform_0, window_bounds = array<i64: 32, 256>}, {transform_indices = @transform_1, window_bounds = array<i64: 256, 128>}, {transform_indices = @transform_2, window_bounds = array<i64: 32, 128>}, {transform_indices = @transform_3, window_bounds = array<i64: 32, 128>}, {transform_indices = @transform_4, window_bounds = array<i64: 32, 128>}]} {
    %c0 = arith.constant 0 : index
    %c0_0 = arith.constant 0 : index
    %0 = vector.load %arg1[%c0, %c0_0] : memref<32x256xbf16, #tpu.memory_space<vmem>>, vector<32x256xbf16>
    %c0_1 = arith.constant 0 : index
    %c0_2 = arith.constant 0 : index
    %1 = vector.load %arg2[%c0_1, %c0_2] : memref<256x128xbf16, #tpu.memory_space<vmem>>, vector<256x128xbf16>
    %cst = arith.constant dense<0.000000e+00> : vector<32x128xf32>
    %2 = tpu.matmul %0, %1, %cst {dimension_numbers = #tpu.dot_dimension_numbers<[1], [0], [0], [1], [0, 0, 1, 1], [], []>} : vector<32x256xbf16>, vector<256x128xbf16>, vector<32x128xf32> -> vector<32x128xf32>
    %c0_3 = arith.constant 0 : index
    %c0_4 = arith.constant 0 : index
    %3 = vector.load %arg3[%c0_3, %c0_4] : memref<32x128xf32, #tpu.memory_space<vmem>>, vector<32x128xf32>
    tpu.vector_store %arg3[%c0_3, %c0_4], %2 {strides = array<i32>} : memref<32x128xf32, #tpu.memory_space<vmem>>, vector<32x128xf32>,
    %cst_5 = arith.constant dense<0.000000e+00> : vector<32xf32>
    %4 = vector.multi_reduction <add>, %2, %cst_5 [1] : vector<32x128xf32> to vector<32xf32>
    %5 = vector.shape_cast %4 : vector<32xf32> to vector<32x1xf32>
    %6 = arith.mulf %2, %2 : vector<32x128xf32>
    %cst_6 = arith.constant dense<0.000000e+00> : vector<32xf32>
    %7 = vector.multi_reduction <add>, %6, %cst_6 [1] : vector<32x128xf32> to vector<32xf32>
    %8 = vector.shape_cast %7 : vector<32xf32> to vector<32x1xf32>
    %9 = vector.shape_cast %5 : vector<32x1xf32> to vector<32x1xf32>
    %10 = vector.broadcast %9 : vector<32x1xf32> to vector<32x128xf32>
    %c0_7 = arith.constant 0 : index
    %c0_8 = arith.constant 0 : index
    %11 = vector.load %arg4[%c0_7, %c0_8] : memref<32x128xf32, #tpu.memory_space<vmem>>, vector<32x128xf32>
    tpu.vector_store %arg4[%c0_7, %c0_8], %10 {strides = array<i32>} : memref<32x128xf32, #tpu.memory_space<vmem>>, vector<32x128xf32>,
    %12 = vector.shape_cast %8 : vector<32x1xf32> to vector<32x1xf32>
    %13 = vector.broadcast %12 : vector<32x1xf32> to vector<32x128xf32>
    %c0_9 = arith.constant 0 : index
    %c0_10 = arith.constant 0 : index
    %14 = vector.load %arg5[%c0_9, %c0_10] : memref<32x128xf32, #tpu.memory_space<vmem>>, vector<32x128xf32>
    tpu.vector_store %arg5[%c0_9, %c0_10], %13 {strides = array<i32>} : memref<32x128xf32, #tpu.memory_space<vmem>>, vector<32x128xf32>,
    return
  }
  func.func @transform_0(%arg0: i32) -> (i32, i32) {
    %c0_i32 = arith.constant 0 : i32
    %c0_i32_0 = arith.constant 0 : i32
    %c0_i32_1 = arith.constant 0 : i32
    return %c0_i32, %c0_i32_0 : i32, i32
  }
  func.func @transform_1(%arg0: i32) -> (i32, i32) {
    %c0_i32 = arith.constant 0 : i32
    %c0_i32_0 = arith.constant 0 : i32
    return %c0_i32, %arg0 : i32, i32
  }
  func.func @transform_2(%arg0: i32) -> (i32, i32) {
    %c0_i32 = arith.constant 0 : i32
    %c0_i32_0 = arith.constant 0 : i32
    return %c0_i32, %arg0 : i32, i32
  }
  func.func @transform_3(%arg0: i32) -> (i32, i32) {
    %c0_i32 = arith.constant 0 : i32
    %c0_i32_0 = arith.constant 0 : i32
    return %c0_i32, %arg0 : i32, i32
  }
  func.func @transform_4(%arg0: i32) -> (i32, i32) {
    %c0_i32 = arith.constant 0 : i32
    %c0_i32_0 = arith.constant 0 : i32
    return %c0_i32, %arg0 : i32, i32
  }
}

module attributes {stable_mosaic.version = 11 : i64} {
  func.func @_conv_stats_kernel(%arg0: i32, %arg1: memref<64x512xbf16, #tpu.memory_space<vmem>>, %arg2: memref<512x128xbf16, #tpu.memory_space<vmem>>, %arg3: memref<64x128xf32, #tpu.memory_space<vmem>>, %arg4: memref<64x128xf32, #tpu.memory_space<vmem>>, %arg5: memref<64x128xf32, #tpu.memory_space<vmem>>) attributes {dimension_semantics = [#tpu.dimension_semantics<parallel>], iteration_bounds = array<i64: 1>, scalar_prefetch = 0 : i64, scratch_operands = 0 : i64, tpu.core_type = #tpu.core_type<tc>, window_params = [{pipeline_mode = #tpu.pipeline_mode<synchronous>, transform_indices = @transform_0, window_bounds = array<i64: 64, 512>}, {transform_indices = @transform_1, window_bounds = array<i64: 512, 128>}, {transform_indices = @transform_2, window_bounds = array<i64: 64, 128>}, {transform_indices = @transform_3, window_bounds = array<i64: 64, 128>}, {transform_indices = @transform_4, window_bounds = array<i64: 64, 128>}]} {
    %c0 = arith.constant 0 : index
    %c0_0 = arith.constant 0 : index
    %0 = vector.load %arg1[%c0, %c0_0] : memref<64x512xbf16, #tpu.memory_space<vmem>>, vector<64x512xbf16>
    %c0_1 = arith.constant 0 : index
    %c0_2 = arith.constant 0 : index
    %1 = vector.load %arg2[%c0_1, %c0_2] : memref<512x128xbf16, #tpu.memory_space<vmem>>, vector<512x128xbf16>
    %cst = arith.constant dense<0.000000e+00> : vector<64x128xf32>
    %2 = tpu.matmul %0, %1, %cst {dimension_numbers = #tpu.dot_dimension_numbers<[1], [0], [0], [1], [0, 0, 1, 1], [], []>} : vector<64x512xbf16>, vector<512x128xbf16>, vector<64x128xf32> -> vector<64x128xf32>
    %c0_3 = arith.constant 0 : index
    %c0_4 = arith.constant 0 : index
    %3 = vector.load %arg3[%c0_3, %c0_4] : memref<64x128xf32, #tpu.memory_space<vmem>>, vector<64x128xf32>
    tpu.vector_store %arg3[%c0_3, %c0_4], %2 {strides = array<i32>} : memref<64x128xf32, #tpu.memory_space<vmem>>, vector<64x128xf32>,
    %cst_5 = arith.constant dense<0.000000e+00> : vector<64xf32>
    %4 = vector.multi_reduction <add>, %2, %cst_5 [1] : vector<64x128xf32> to vector<64xf32>
    %5 = vector.shape_cast %4 : vector<64xf32> to vector<64x1xf32>
    %6 = arith.mulf %2, %2 : vector<64x128xf32>
    %cst_6 = arith.constant dense<0.000000e+00> : vector<64xf32>
    %7 = vector.multi_reduction <add>, %6, %cst_6 [1] : vector<64x128xf32> to vector<64xf32>
    %8 = vector.shape_cast %7 : vector<64xf32> to vector<64x1xf32>
    %9 = vector.shape_cast %5 : vector<64x1xf32> to vector<64x1xf32>
    %10 = vector.broadcast %9 : vector<64x1xf32> to vector<64x128xf32>
    %c0_7 = arith.constant 0 : index
    %c0_8 = arith.constant 0 : index
    %11 = vector.load %arg4[%c0_7, %c0_8] : memref<64x128xf32, #tpu.memory_space<vmem>>, vector<64x128xf32>
    tpu.vector_store %arg4[%c0_7, %c0_8], %10 {strides = array<i32>} : memref<64x128xf32, #tpu.memory_space<vmem>>, vector<64x128xf32>,
    %12 = vector.shape_cast %8 : vector<64x1xf32> to vector<64x1xf32>
    %13 = vector.broadcast %12 : vector<64x1xf32> to vector<64x128xf32>
    %c0_9 = arith.constant 0 : index
    %c0_10 = arith.constant 0 : index
    %14 = vector.load %arg5[%c0_9, %c0_10] : memref<64x128xf32, #tpu.memory_space<vmem>>, vector<64x128xf32>
    tpu.vector_store %arg5[%c0_9, %c0_10], %13 {strides = array<i32>} : memref<64x128xf32, #tpu.memory_space<vmem>>, vector<64x128xf32>,
    return
  }
  func.func @transform_0(%arg0: i32) -> (i32, i32) {
    %c0_i32 = arith.constant 0 : i32
    %c0_i32_0 = arith.constant 0 : i32
    %c0_i32_1 = arith.constant 0 : i32
    return %c0_i32, %c0_i32_0 : i32, i32
  }
  func.func @transform_1(%arg0: i32) -> (i32, i32) {
    %c0_i32 = arith.constant 0 : i32
    %c0_i32_0 = arith.constant 0 : i32
    return %c0_i32, %arg0 : i32, i32
  }
  func.func @transform_2(%arg0: i32) -> (i32, i32) {
    %c0_i32 = arith.constant 0 : i32
    %c0_i32_0 = arith.constant 0 : i32
    return %c0_i32, %arg0 : i32, i32
  }
  func.func @transform_3(%arg0: i32) -> (i32, i32) {
    %c0_i32 = arith.constant 0 : i32
    %c0_i32_0 = arith.constant 0 : i32
    return %c0_i32, %arg0 : i32, i32
  }
  func.func @transform_4(%arg0: i32) -> (i32, i32) {
    %c0_i32 = arith.constant 0 : i32
    %c0_i32_0 = arith.constant 0 : i32
    return %c0_i32, %arg0 : i32, i32
  }
}

module attributes {stable_mosaic.version = 11 : i64} {
  func.func @_bn_leaky_apply_kernel(%arg0: i32, %arg1: memref<64x128xf32, #tpu.memory_space<vmem>>, %arg2: memref<64x1xf32, #tpu.memory_space<vmem>>, %arg3: memref<64x1xf32, #tpu.memory_space<vmem>>, %arg4: memref<64x128xbf16, #tpu.memory_space<vmem>>) attributes {dimension_semantics = [#tpu.dimension_semantics<parallel>], iteration_bounds = array<i64: 1>, scalar_prefetch = 0 : i64, scratch_operands = 0 : i64, tpu.core_type = #tpu.core_type<tc>, window_params = [{transform_indices = @transform_0, window_bounds = array<i64: 64, 128>}, {pipeline_mode = #tpu.pipeline_mode<synchronous>, transform_indices = @transform_1, window_bounds = array<i64: 64, 1>}, {pipeline_mode = #tpu.pipeline_mode<synchronous>, transform_indices = @transform_2, window_bounds = array<i64: 64, 1>}, {transform_indices = @transform_3, window_bounds = array<i64: 64, 128>}]} {
    %c0 = arith.constant 0 : index
    %c0_0 = arith.constant 0 : index
    %0 = vector.load %arg1[%c0, %c0_0] : memref<64x128xf32, #tpu.memory_space<vmem>>, vector<64x128xf32>
    %c0_1 = arith.constant 0 : index
    %c0_2 = arith.constant 0 : index
    %1 = vector.load %arg2[%c0_1, %c0_2] : memref<64x1xf32, #tpu.memory_space<vmem>>, vector<64x1xf32>
    %2 = vector.broadcast %1 : vector<64x1xf32> to vector<64x128xf32>
    %3 = arith.mulf %0, %2 : vector<64x128xf32>
    %c0_3 = arith.constant 0 : index
    %c0_4 = arith.constant 0 : index
    %4 = vector.load %arg3[%c0_3, %c0_4] : memref<64x1xf32, #tpu.memory_space<vmem>>, vector<64x1xf32>
    %5 = vector.broadcast %4 : vector<64x1xf32> to vector<64x128xf32>
    %6 = arith.addf %3, %5 : vector<64x128xf32>
    %cst = arith.constant 0.000000e+00 : f32
    %7 = vector.broadcast %cst : f32 to vector<64x128xf32>
    %8 = arith.cmpf oge, %6, %7 : vector<64x128xf32>
    %cst_5 = arith.constant 2.000000e-01 : f32
    %9 = vector.broadcast %cst_5 : f32 to vector<64x128xf32>
    %10 = arith.mulf %9, %6 : vector<64x128xf32>
    %11 = arith.select %8, %6, %10 : vector<64x128xi1>, vector<64x128xf32>
    %12 = arith.truncf %11 : vector<64x128xf32> to vector<64x128xbf16>
    %c0_6 = arith.constant 0 : index
    %c0_7 = arith.constant 0 : index
    %13 = vector.load %arg4[%c0_6, %c0_7] : memref<64x128xbf16, #tpu.memory_space<vmem>>, vector<64x128xbf16>
    tpu.vector_store %arg4[%c0_6, %c0_7], %12 {strides = array<i32>} : memref<64x128xbf16, #tpu.memory_space<vmem>>, vector<64x128xbf16>,
    return
  }
  func.func @transform_0(%arg0: i32) -> (i32, i32) {
    %c0_i32 = arith.constant 0 : i32
    %c0_i32_0 = arith.constant 0 : i32
    return %c0_i32, %arg0 : i32, i32
  }
  func.func @transform_1(%arg0: i32) -> (i32, i32) {
    %c0_i32 = arith.constant 0 : i32
    %c0_i32_0 = arith.constant 0 : i32
    %c0_i32_1 = arith.constant 0 : i32
    return %c0_i32, %c0_i32_0 : i32, i32
  }
  func.func @transform_2(%arg0: i32) -> (i32, i32) {
    %c0_i32 = arith.constant 0 : i32
    %c0_i32_0 = arith.constant 0 : i32
    %c0_i32_1 = arith.constant 0 : i32
    return %c0_i32, %c0_i32_0 : i32, i32
  }
  func.func @transform_3(%arg0: i32) -> (i32, i32) {
    %c0_i32 = arith.constant 0 : i32
    %c0_i32_0 = arith.constant 0 : i32
    return %c0_i32, %arg0 : i32, i32
  }
}

module attributes {stable_mosaic.version = 11 : i64} {
  func.func @kernel(%arg0: i32, %arg1: memref<8x1024xbf16, #tpu.memory_space<vmem>>, %arg2: memref<1024x128xbf16, #tpu.memory_space<vmem>>, %arg3: memref<8x1xf32, #tpu.memory_space<vmem>>, %arg4: memref<8x128xf32, #tpu.memory_space<vmem>>) attributes {dimension_semantics = [#tpu.dimension_semantics<parallel>], iteration_bounds = array<i64: 1>, scalar_prefetch = 0 : i64, scratch_operands = 0 : i64, tpu.core_type = #tpu.core_type<tc>, window_params = [{pipeline_mode = #tpu.pipeline_mode<synchronous>, transform_indices = @transform_0, window_bounds = array<i64: 8, 1024>}, {transform_indices = @transform_1, window_bounds = array<i64: 1024, 128>}, {pipeline_mode = #tpu.pipeline_mode<synchronous>, transform_indices = @transform_2, window_bounds = array<i64: 8, 1>}, {transform_indices = @transform_3, window_bounds = array<i64: 8, 128>}]} {
    %c0 = arith.constant 0 : index
    %c0_0 = arith.constant 0 : index
    %0 = vector.load %arg1[%c0, %c0_0] : memref<8x1024xbf16, #tpu.memory_space<vmem>>, vector<8x1024xbf16>
    %c0_1 = arith.constant 0 : index
    %c0_2 = arith.constant 0 : index
    %1 = vector.load %arg2[%c0_1, %c0_2] : memref<1024x128xbf16, #tpu.memory_space<vmem>>, vector<1024x128xbf16>
    %cst = arith.constant dense<0.000000e+00> : vector<8x128xf32>
    %2 = tpu.matmul %0, %1, %cst {dimension_numbers = #tpu.dot_dimension_numbers<[1], [0], [0], [1], [0, 0, 1, 1], [], []>} : vector<8x1024xbf16>, vector<1024x128xbf16>, vector<8x128xf32> -> vector<8x128xf32>
    %c0_3 = arith.constant 0 : index
    %c0_4 = arith.constant 0 : index
    %3 = vector.load %arg3[%c0_3, %c0_4] : memref<8x1xf32, #tpu.memory_space<vmem>>, vector<8x1xf32>
    %4 = vector.broadcast %3 : vector<8x1xf32> to vector<8x128xf32>
    %5 = arith.addf %2, %4 : vector<8x128xf32>
    %c0_5 = arith.constant 0 : index
    %c0_6 = arith.constant 0 : index
    %6 = vector.load %arg4[%c0_5, %c0_6] : memref<8x128xf32, #tpu.memory_space<vmem>>, vector<8x128xf32>
    tpu.vector_store %arg4[%c0_5, %c0_6], %5 {strides = array<i32>} : memref<8x128xf32, #tpu.memory_space<vmem>>, vector<8x128xf32>,
    return
  }
  func.func @transform_0(%arg0: i32) -> (i32, i32) {
    %c0_i32 = arith.constant 0 : i32
    %c0_i32_0 = arith.constant 0 : i32
    %c0_i32_1 = arith.constant 0 : i32
    return %c0_i32, %c0_i32_0 : i32, i32
  }
  func.func @transform_1(%arg0: i32) -> (i32, i32) {
    %c0_i32 = arith.constant 0 : i32
    %c0_i32_0 = arith.constant 0 : i32
    return %c0_i32, %arg0 : i32, i32
  }
  func.func @transform_2(%arg0: i32) -> (i32, i32) {
    %c0_i32 = arith.constant 0 : i32
    %c0_i32_0 = arith.constant 0 : i32
    %c0_i32_1 = arith.constant 0 : i32
    return %c0_i32, %c0_i32_0 : i32, i32
  }
  func.func @transform_3(%arg0: i32) -> (i32, i32) {
    %c0_i32 = arith.constant 0 : i32
    %c0_i32_0 = arith.constant 0 : i32
    return %c0_i32, %arg0 : i32, i32
  }
}

</mosaic_0001>

<bundles_post_ra>
// kernel: _lambda_.8
= control target key start
LH: loop header
LB: loop body
LE: loop exit
PB: predicated region body
PF: predicated region fallthrough
CT: control target
= control target key end

     0   :  { %s464_s12 = smov 0   ;;  %s466_s13 = smov 0   ;;  %s524_s0 = inlined_call_operand.vmem [shape: bf16[8,64], index: 0, kind: input, shape index: {}]   ;;  %s525_s1 = inlined_call_operand.vmem [shape: bf16[64,256], index: 1, kind: input, shape index: {}]   ;;  %s526_s2 = inlined_call_operand.vmem [shape: f32[8,1], index: 2, kind: input, shape index: {}]   ;;  %s527_s3 = inlined_call_operand.vmem [shape: bf16[8,256], index: 3, kind: output, shape index: {}]  }
   0x1   :  { %s468_s14 = smov 0  }
   0x2 LB: > { %s361_s15 = sadd.s32 4294967295, %s441_s14   ;;  %s481_s16 = sadd.s32 1, %s441_s14   ;;  %s441_s14 = sphi %s468_s14, %s530_s14   ;;  %s437_s13 = sphi %s466_s13, %s529_s13   ;;  %s433_s12 = sphi %s464_s12, %s528_s12  }
   0x3   : > { %s38_s17 = ssub.s32 %s441_s14, %s481_s16  ;;  %s41_s18 = sadd.s32 1, %s437_s13 }
   0x4   : > { %p39_p0 = scmp.eq.s32.totalorder %s38_s17, 0  ;;  %p48_p1 = scmp.ne.s32.totalorder %s437_s13, %s433_s12 }
   0x5   : > { %p49_p2 = scmp.eq.s32.totalorder %s441_s14, 0  ;;  %p364_p4 = scmp.ge.s32.totalorder %s441_s14, 2 }
   0x6   : > { %s490_s19 = scalar_select %p39_p0, %s437_s13, %s41_s18  }
   0x7   : > { %p50_p3 = por %p49_p2, %p48_p1  ;;  %127 = sbr.rel (%p364_p4) target bundleno = 24 (0x18), region = 24 }
   0xc   : > { %130 = sbr.rel (!%p50_p3) target bundleno = 24 (0x18), region = 28  ;;  %s132_s20 = sand.u32 (%p50_p3), 1, %s437_s13  }
   0xd   : > { %s366_s21 = sshll.u32 (%p50_p3), %s441_s14, 2  ;;  %s365_s22 = sshll.u32 (%p50_p3), %s132_s20, 5 }
   0xe   : > { %s136_s25 = scalar_lea.vmem (%p50_p3), %s525_s1, %s366_s21  ;;  %s134_s26 = scalar_lea.vmem (%p50_p3), [#allocation2], %s365_s22 }
   0xf   : > { %v153_v0 = vld [vmem:[%s136_s25] sm:$0xf] (%p50_p3)  ;;  %v155_v1 = vld [vmem:[%s136_s25 + $0x8] sm:$0xf] (%p50_p3)  ;;  %v157_v2 = vld [vmem:[%s136_s25 + $0x10] sm:$0xf] (%p50_p3) }
  0x10   : > { %154 = vst [vmem:[%s134_s26] sm:$0xf] (%p50_p3), %v153_v0  ;;  %v159_v3 = vld [vmem:[%s136_s25 + $0x18] sm:$0xf] (%p50_p3)  ;;  %v161_v4 = vld [vmem:[%s136_s25 + $0x20] sm:$0xf] (%p50_p3) }
  0x11   : > { %156 = vst [vmem:[%s134_s26 + $0x4] sm:$0xf] %v155_v1  ;;  %v163_v5 = vld [vmem:[%s136_s25 + $0x28] sm:$0xf]  ;;  %v165_v6 = vld [vmem:[%s136_s25 + $0x30] sm:$0xf] }
  0x12   : > { %158 = vst [vmem:[%s134_s26 + $0x8] sm:$0xf] %v157_v2  ;;  %v167_v7 = vld [vmem:[%s136_s25 + $0x38] sm:$0xf] }
  0x13   : > { %160 = vst [vmem:[%s134_s26 + $0xc] sm:$0xf] %v159_v3 }
  0x14   : > { %162 = vst [vmem:[%s134_s26 + $0x10] sm:$0xf] %v161_v4 }
  0x15   : > { %164 = vst [vmem:[%s134_s26 + $0x14] sm:$0xf] %v163_v5 }
  0x16   : > { %166 = vst [vmem:[%s134_s26 + $0x18] sm:$0xf] %v165_v6 }
  0x17   : > { %168 = vst [vmem:[%s134_s26 + $0x1c] sm:$0xf] %v167_v7 }
  0x18 PF: > { %p367_p5 = scmp.ge.s32.totalorder %s441_s14, 1  ;;  %p207_p6 = scmp.lt.s32.totalorder %s441_s14, 3 }
  0x1a   : > { %p208_p7 = pnand %p367_p5, %p207_p6 }
  0x1b   : > { %s214_s27 = sand.u32 (!%p208_p7), 1, %s433_s12   ;;  %p236_p8 = scmp.lt.s32.totalorder (!%p208_p7), %s361_s15, 1 }
  0x1c   : > { %211 = sbr.rel (%p208_p7) target bundleno = 183 (0xb7), region = 69  ;;  %s368_s30 = sshll.u32 (!%p208_p7), %s214_s27, 5 }
  0x1d   : > { %s216_s4 = scalar_lea.vmem (!%p208_p7), [#allocation2], %s368_s30 }
  0x21   : > { %v250_v8 = vld [vmem:[%s526_s2] sm:$0xff]  ;;  %v443_v9 = vmov 0   ;;  %v392_v10 = vld [vmem:[%s216_s4 + $0x18] sm:$0xff]  ;;  %v391_v11 = vld [vmem:[%s216_s4 + $0x10] sm:$0xff]  ;;  %vm280_vm0 = vcmask 523264   ;;  %s532_s15 = smov (!%p236_p8, %s361_s15), 1 }
  0x22   : > { %418 = vset.pattern.permute.xlu0 %v443_v9  ;;  %288 = vmatpush.bf16.msra.mxu0 %v392_v10  ;;  %v390_v12 = vld [vmem:[%s216_s4 + $0x8] sm:$0xff]  ;;  %v389_v13 = vld [vmem:[%s216_s4] sm:$0xff]  ;;  %s369_s7 = sshll.u32 %s532_s15, 2 }
  0x23   : > { %253 = vperm.xlu0 %418, %v250_v8   ;;  %v241_v14 = vld [vmem:[%s524_s0] sm:$0xf]  ;;  %s239_s10 = scalar_lea.vmem %s527_s3, %s369_s7 }
  0x26   : > { %289 = vmatpush.bf16.msra.mxu0 %v391_v11 }
  0x2a   : > { %290 = vmatpush.bf16.msra.mxu0 %v390_v12 }
  0x2e   : > { %291 = vmatpush.bf16.msra.mxu0 %v389_v13 }
  0x31   : > { %386 = vmatmul.msk.bf16.vlgmr.msra.gmra.mxu0 %vm280_vm0, %v241_v14 }
  0x95   : > { %v254_v15 = vpop.permute.xlu0 %253 }
  0xae   : > { %v293_v16 = vpop.f32.mrf.mxu0 }
  0xaf   : > { %v294_v17 = vadd.f32 %v293_v16, %v254_v15 }
  0xb1   : > { %vm297_vm1 = vcmp.ge.f32.partialorder %v294_v17, 0.0  ;;  %v298_v18 = vmul.f32 0.2, %v294_v17 }
  0xb3   : > { %v299_v19 = vsel %vm297_vm1, %v294_v17, %v298_v18 }
  0xb4   : > { %v300_v20 = vpack.c.bf16 %v299_v19, %v299_v19 }
  0xb6   : > { %301 = vst [vmem:[%s239_s10] sm:$0xf] %v300_v20  ;;  %v295_v21 = vpop.f32.mrf.mxu0 }
  0xb7 PF: > { %p10_p9 = scmp.ge.s32.totalorder %s481_s16, 4   ;;  %s528_s12 = smov %s437_s13 }
  0xb8   : > { %s529_s13 = smov %s490_s19  ;;  %s530_s14 = smov %s481_s16 }
  0xb9   :  { %12 = sbr.rel (!%p10_p9) target bundleno = 2 (0x2), region = 108 }

// kernel: _lambda_.9
= control target key start
LH: loop header
LB: loop body
LE: loop exit
PB: predicated region body
PF: predicated region fallthrough
CT: control target
= control target key end

     0   :  { %s243_s1 = inlined_call_operand.vmem [shape: bf16[128,128], index: 1, kind: input, shape index: {}]   ;;  %s244_s0 = inlined_call_operand.vmem [shape: bf16[16,128], index: 0, kind: input, shape index: {}]   ;;  %s245_s2 = inlined_call_operand.vmem [shape: f32[16,128], index: 2, kind: output, shape index: {0}]   ;;  %s246_s3 = inlined_call_operand.vmem [shape: f32[16,128], index: 3, kind: output, shape index: {1}]   ;;  %s247_s4 = inlined_call_operand.vmem [shape: f32[16,128], index: 4, kind: output, shape index: {2}]  }
   0x1   :  { %v172_v0 = vld [vmem:[%s243_s1 + $0x38] sm:$0xff]  ;;  %v171_v1 = vld [vmem:[%s243_s1 + $0x30] sm:$0xff]  ;;  %v170_v2 = vld [vmem:[%s243_s1 + $0x28] sm:$0xff] }
   0x2   :  { %86 = vmatpush.bf16.msra.mxu0 %v172_v0  ;;  %v169_v3 = vld [vmem:[%s243_s1 + $0x20] sm:$0xff]  ;;  %v168_v4 = vld [vmem:[%s243_s1 + $0x18] sm:$0xff]  ;;  %v167_v5 = vld [vmem:[%s243_s1 + $0x10] sm:$0xff] }
   0x3   :  { %v166_v6 = vld [vmem:[%s243_s1 + $0x8] sm:$0xff]  ;;  %v165_v7 = vld [vmem:[%s243_s1] sm:$0xff] }
   0x4   :  { %v164_v8 = vld [vmem:[%s244_s0] sm:$0xff] }
   0x6   :  { %87 = vmatpush.bf16.msra.mxu0 %v171_v1 }
   0xa   :  { %88 = vmatpush.bf16.msra.mxu0 %v170_v2 }
   0xe   :  { %89 = vmatpush.bf16.msra.mxu0 %v169_v3 }
  0x12   :  { %90 = vmatpush.bf16.msra.mxu0 %v168_v4 }
  0x16   :  { %91 = vmatpush.bf16.msra.mxu0 %v167_v5 }
  0x1a   :  { %92 = vmatpush.bf16.msra.mxu0 %v166_v6 }
  0x1e   :  { %93 = vmatpush.bf16.msra.mxu0 %v165_v7 }
  0x21   :  { %94 = vmatmul.bf16.vlgmr.msra.gmra.mxu0 %v164_v8 }
  0x9e   :  { %v95_v9 = vpop.f32.mrf.mxu0 }
  0x9f   :  { %102 = vadd.xlane.f32.xlu0 %v95_v9  ;;  %v106_v10 = vmul.f32 %v95_v9, %v95_v9  ;;  %100 = vst [vmem:[%s245_s2] sm:$0xff] %v95_v9 }
  0xa1   :  { %108 = vadd.xlane.f32.xlu1 %v106_v10 }
  0xa6   :  { %v97_v11 = vpop.f32.mrf.mxu0 }
  0xa7   :  { %101 = vst [vmem:[%s245_s2 + $0x8] sm:$0xff] %v97_v11  ;;  %104 = vadd.xlane.f32.xlu0 %v97_v11  ;;  %v107_v12 = vmul.f32 %v97_v11, %v97_v11 }
  0xa9   :  { %110 = vadd.xlane.f32.xlu1 %v107_v12 }
 0x112   :  { %v103_v13 = vpop.xlane.xlu0 %102 }
 0x113   :  { %112 = vst [vmem:[%s246_s3] sm:$0xff] %v103_v13 }
 0x114   :  { %v109_v14 = vpop.xlane.xlu1 %108 }
 0x115   :  { %114 = vst [vmem:[%s247_s4] sm:$0xff] %v109_v14 }
 0x11a   :  { %v105_v15 = vpop.xlane.xlu0 %104 }
 0x11b   :  { %113 = vst [vmem:[%s246_s3 + $0x8] sm:$0xff] %v105_v15 }
 0x11c   :  { %v111_v16 = vpop.xlane.xlu1 %110 }
 0x11d   :  { %115 = vst [vmem:[%s247_s4 + $0x8] sm:$0xff] %v111_v16 }

// kernel: _lambda_.10
= control target key start
LH: loop header
LB: loop body
LE: loop exit
PB: predicated region body
PF: predicated region fallthrough
CT: control target
= control target key end

     0   :  { %v66_v0 = vmov 0   ;;  %s108_s2 = inlined_call_operand.vmem [shape: f32[16,1], index: 2, kind: input, shape index: {}]   ;;  %s109_s1 = inlined_call_operand.vmem [shape: f32[16,1], index: 1, kind: input, shape index: {}]   ;;  %s110_s0 = inlined_call_operand.vmem [shape: f32[16,128], index: 0, kind: input, shape index: {}]   ;;  %s111_s3 = inlined_call_operand.vmem [shape: bf16[16,128], index: 3, kind: output, shape index: {}]  }
   0x1   :  { %65 = vset.pattern.permute.xlu1 %v66_v0  ;;  %64 = vset.pattern.permute.xlu0 %v66_v0  ;;  %v30_v1 = vld [vmem:[%s108_s2] sm:$0xff]  ;;  %v31_v3 = vld [vmem:[%s108_s2 + $0x8] sm:$0xff] }
   0x2   :  { %v16_v2 = vld [vmem:[%s109_s1] sm:$0xff]  ;;  %34 = vperm.xlu1 %65, %v30_v1   ;;  %v17_v4 = vld [vmem:[%s109_s1 + $0x8] sm:$0xff] }
   0x3   :  { %20 = vperm.xlu0 %64, %v16_v2   ;;  %v14_v7 = vld [vmem:[%s110_s0] sm:$0xff]  ;;  %v15_v9 = vld [vmem:[%s110_s0 + $0x8] sm:$0xff] }
   0xa   :  { %39 = vperm.xlu1 %65, %v31_v3  }
   0xb   :  { %25 = vperm.xlu0 %64, %v17_v4  }
  0x74   :  { %v35_v5 = vpop.permute.xlu1 %34 }
  0x75   :  { %v21_v6 = vpop.permute.xlu0 %20 }
  0x76   :  { %v28_v8 = vmul.f32 %v21_v6, %v14_v7 }
  0x78   :  { %v42_v10 = vadd.f32 %v35_v5, %v28_v8 }
  0x7a   :  { %v46_v14 = vmul.f32 0.2, %v42_v10  ;;  %vm44_vm0 = vcmp.ge.f32.partialorder %v42_v10, 0.0 }
  0x7c   :  { %v40_v13 = vpop.permute.xlu1 %39  ;;  %v48_v17 = vsel %vm44_vm0, %v42_v10, %v46_v14 }
  0x7d   :  { %v26_v11 = vpop.permute.xlu0 %25 }
  0x7e   :  { %v29_v12 = vmul.f32 %v26_v11, %v15_v9 }
  0x80   :  { %v43_v15 = vadd.f32 %v40_v13, %v29_v12 }
  0x82   :  { %vm45_vm1 = vcmp.ge.f32.partialorder %v43_v15, 0.0  ;;  %v47_v16 = vmul.f32 0.2, %v43_v15 }
  0x84   :  { %v49_v18 = vsel %vm45_vm1, %v43_v15, %v47_v16 }
  0x85   :  { %v61_v19 = vpack.c.bf16 %v49_v18, %v48_v17 }
  0x87   :  { %62 = vst [vmem:[%s111_s3] sm:$0xff] %v61_v19  }

// kernel: _lambda_.12
= control target key start
LH: loop header
LB: loop body
LE: loop exit
PB: predicated region body
PF: predicated region fallthrough
CT: control target
= control target key end

     0   :  { %v113_v0 = vmov 0   ;;  %s176_s1 = inlined_call_operand.vmem [shape: f32[32,1], index: 1, kind: input, shape index: {}]   ;;  %s177_s2 = inlined_call_operand.vmem [shape: f32[32,1], index: 2, kind: input, shape index: {}]   ;;  %s178_s0 = inlined_call_operand.vmem [shape: f32[32,128], index: 0, kind: input, shape index: {}]   ;;  %s179_s3 = inlined_call_operand.vmem [shape: bf16[32,128], index: 3, kind: output, shape index: {}]  }
   0x1   :  { %111 = vset.pattern.permute.xlu1 %v113_v0  ;;  %110 = vset.pattern.permute.xlu0 %v113_v0  ;;  %v20_v1 = vld [vmem:[%s176_s1 + $0x10] sm:$0xff]  ;;  %v18_v2 = vld [vmem:[%s176_s1] sm:$0xff]  ;;  %v21_v4 = vld [vmem:[%s176_s1 + $0x18] sm:$0xff] }
   0x2   :  { %34 = vperm.xlu1 %111, %v20_v1   ;;  %24 = vperm.xlu0 %110, %v18_v2   ;;  %v46_v3 = vld [vmem:[%s177_s2] sm:$0xff]  ;;  %v19_v5 = vld [vmem:[%s176_s1 + $0x8] sm:$0xff]  ;;  %v49_v7 = vld [vmem:[%s177_s2 + $0x18] sm:$0xff] }
   0x3   :  { %112 = vset.pattern.permute.xlu2 %v113_v0  ;;  %v47_v6 = vld [vmem:[%s177_s2 + $0x8] sm:$0xff]  ;;  %v48_v8 = vld [vmem:[%s177_s2 + $0x10] sm:$0xff]  ;;  %v14_v12 = vld [vmem:[%s178_s0] sm:$0xff] }
   0x4   :  { %52 = vperm.xlu2 %112, %v46_v3   ;;  %v15_v14 = vld [vmem:[%s178_s0 + $0x8] sm:$0xff]  ;;  %v16_v22 = vld [vmem:[%s178_s0 + $0x10] sm:$0xff]  ;;  %v17_v23 = vld [vmem:[%s178_s0 + $0x18] sm:$0xff] }
   0xa   :  { %39 = vperm.xlu1 %111, %v21_v4   ;;  %29 = vperm.xlu0 %110, %v19_v5  }
   0xc   :  { %57 = vperm.xlu2 %112, %v47_v6  }
  0x12   :  { %67 = vperm.xlu1 %111, %v49_v7   ;;  %62 = vperm.xlu0 %110, %v48_v8  }
  0x5e   :  { %v53_v9 = vpop.permute.xlu2 %52 }
  0x66   :  { %v58_v19 = vpop.permute.xlu2 %57 }
  0x74   :  { %v35_v10 = vpop.permute.xlu1 %34  ;;  %v25_v11 = vpop.permute.xlu0 %24 }
  0x75   :  { %v42_v13 = vmul.f32 %v25_v11, %v14_v12  ;;  %v44_v25 = vmul.f32 %v35_v10, %v16_v22 }
  0x77   :  { %v70_v15 = vadd.f32 %v53_v9, %v42_v13 }
  0x79   :  { %v78_v20 = vmul.f32 0.2, %v70_v15  ;;  %vm74_vm0 = vcmp.ge.f32.partialorder %v70_v15, 0.0 }
  0x7b   :  { %v82_v26 = vsel %vm74_vm0, %v70_v15, %v78_v20 }
  0x7c   :  { %v40_v16 = vpop.permute.xlu1 %39  ;;  %v30_v17 = vpop.permute.xlu0 %29 }
  0x7d   :  { %v43_v18 = vmul.f32 %v30_v17, %v15_v14  ;;  %v45_v27 = vmul.f32 %v40_v16, %v17_v23 }
  0x7f   :  { %v71_v21 = vadd.f32 %v58_v19, %v43_v18 }
  0x81   :  { %vm75_vm1 = vcmp.ge.f32.partialorder %v71_v21, 0.0  ;;  %v79_v24 = vmul.f32 0.2, %v71_v21 }
  0x83   :  { %v83_v28 = vsel %vm75_vm1, %v71_v21, %v79_v24 }
  0x84   :  { %v101_v29 = vpack.c.bf16 %v83_v28, %v82_v26  ;;  %v68_v30 = vpop.permute.xlu1 %67  ;;  %v63_v31 = vpop.permute.xlu0 %62 }
  0x85   :  { %v73_v32 = vadd.f32 %v68_v30, %v45_v27  ;;  %v72_v33 = vadd.f32 %v63_v31, %v44_v25 }
  0x86   :  { %102 = vst [vmem:[%s179_s3] sm:$0xff] %v101_v29  }
  0x87   :  { %vm77_vm2 = vcmp.ge.f32.partialorder %v73_v32, 0.0  ;;  %v81_v34 = vmul.f32 0.2, %v73_v32  ;;  %vm76_vm3 = vcmp.ge.f32.partialorder %v72_v33, 0.0  ;;  %v80_v35 = vmul.f32 0.2, %v72_v33 }
  0x89   :  { %v85_v36 = vsel %vm77_vm2, %v73_v32, %v81_v34  ;;  %v84_v37 = vsel %vm76_vm3, %v72_v33, %v80_v35 }
  0x8a   :  { %v106_v38 = vpack.c.bf16 %v85_v36, %v84_v37 }
  0x8c   :  { %108 = vst [vmem:[%s179_s3 + $0x8] sm:$0xff] %v106_v38  }

// kernel: _lambda_.11
= control target key start
LH: loop header
LB: loop body
LE: loop exit
PB: predicated region body
PF: predicated region fallthrough
CT: control target
= control target key end

     0   :  { %s497_s1 = inlined_call_operand.vmem [shape: bf16[256,128], index: 1, kind: input, shape index: {}]   ;;  %s498_s0 = inlined_call_operand.vmem [shape: bf16[32,256], index: 0, kind: input, shape index: {}]   ;;  %s499_s2 = inlined_call_operand.vmem [shape: f32[32,128], index: 2, kind: output, shape index: {0}]   ;;  %s500_s3 = inlined_call_operand.vmem [shape: f32[32,128], index: 3, kind: output, shape index: {1}]   ;;  %s501_s4 = inlined_call_operand.vmem [shape: f32[32,128], index: 4, kind: output, shape index: {2}]  }
   0x1   :  { %v339_v0 = vld [vmem:[%s497_s1 + $0x38] sm:$0xff]  ;;  %v338_v2 = vld [vmem:[%s497_s1 + $0x30] sm:$0xff]  ;;  %v337_v4 = vld [vmem:[%s497_s1 + $0x28] sm:$0xff] }
   0x2   :  { %v347_v1 = vld [vmem:[%s497_s1 + $0x78] sm:$0xff]  ;;  %166 = vmatpush.bf16.msra.mxu0 %v339_v0  ;;  %348 = vmatpush.bf16.msra.mxu2 %v339_v0  ;;  %v346_v3 = vld [vmem:[%s497_s1 + $0x70] sm:$0xff]  ;;  %v345_v5 = vld [vmem:[%s497_s1 + $0x68] sm:$0xff] }
   0x3   :  { %185 = vmatpush.bf16.msra.mxu1 %v347_v1  ;;  %356 = vmatpush.bf16.msra.mxu3 %v347_v1  ;;  %v336_v6 = vld [vmem:[%s497_s1 + $0x20] sm:$0xff]  ;;  %v335_v8 = vld [vmem:[%s497_s1 + $0x18] sm:$0xff]  ;;  %v334_v10 = vld [vmem:[%s497_s1 + $0x10] sm:$0xff] }
   0x4   :  { %v344_v7 = vld [vmem:[%s497_s1 + $0x60] sm:$0xff]  ;;  %v343_v9 = vld [vmem:[%s497_s1 + $0x58] sm:$0xff]  ;;  %v342_v11 = vld [vmem:[%s497_s1 + $0x50] sm:$0xff] }
   0x5   :  { %v333_v12 = vld [vmem:[%s497_s1 + $0x8] sm:$0xff]  ;;  %v332_v14 = vld [vmem:[%s497_s1] sm:$0xff]  ;;  %v258_v18 = vld [vmem:[%s498_s0 + $0x10] sm:$0xf] }
   0x6   :  { %167 = vmatpush.bf16.msra.mxu0 %v338_v2  ;;  %349 = vmatpush.bf16.msra.mxu2 %v338_v2  ;;  %v341_v13 = vld [vmem:[%s497_s1 + $0x48] sm:$0xff]  ;;  %v340_v15 = vld [vmem:[%s497_s1 + $0x40] sm:$0xff]  ;;  %v331_v19 = vld [vmem:[%s498_s0 + $0x14] sm:$0xf0] }
   0x7   :  { %186 = vmatpush.bf16.msra.mxu1 %v346_v3  ;;  %357 = vmatpush.bf16.msra.mxu3 %v346_v3  ;;  %v250_v16 = vld [vmem:[%s498_s0] sm:$0xf]  ;;  %v329_v17 = vld [vmem:[%s498_s0 + $0x4] sm:$0xf0]  ;;  %v328_v20 = vld [vmem:[%s498_s0 + $0x4] sm:$0xf]  ;;  %v259_v25 = vor.u32 %v331_v19, %v258_v18 }
   0x8   :  { %v252_v21 = vld [vmem:[%s498_s0 + $0x8] sm:$0xf0]  ;;  %v330_v22 = vld [vmem:[%s498_s0 + $0x14] sm:$0xf]  ;;  %v260_v23 = vld [vmem:[%s498_s0 + $0x18] sm:$0xf0]  ;;  %v251_v24 = vor.u32 %v329_v17, %v250_v16 }
   0x9   :  { %v255_v26 = vor.u32 %v328_v20, %v252_v21  ;;  %v263_v27 = vor.u32 %v330_v22, %v260_v23 }
   0xa   :  { %168 = vmatpush.bf16.msra.mxu0 %v337_v4  ;;  %350 = vmatpush.bf16.msra.mxu2 %v337_v4 }
   0xb   :  { %187 = vmatpush.bf16.msra.mxu1 %v345_v5  ;;  %358 = vmatpush.bf16.msra.mxu3 %v345_v5 }
   0xe   :  { %169 = vmatpush.bf16.msra.mxu0 %v336_v6  ;;  %351 = vmatpush.bf16.msra.mxu2 %v336_v6 }
   0xf   :  { %188 = vmatpush.bf16.msra.mxu1 %v344_v7  ;;  %359 = vmatpush.bf16.msra.mxu3 %v344_v7 }
  0x12   :  { %170 = vmatpush.bf16.msra.mxu0 %v335_v8  ;;  %352 = vmatpush.bf16.msra.mxu2 %v335_v8 }
  0x13   :  { %189 = vmatpush.bf16.msra.mxu1 %v343_v9  ;;  %360 = vmatpush.bf16.msra.mxu3 %v343_v9 }
  0x16   :  { %171 = vmatpush.bf16.msra.mxu0 %v334_v10  ;;  %353 = vmatpush.bf16.msra.mxu2 %v334_v10 }
  0x17   :  { %190 = vmatpush.bf16.msra.mxu1 %v342_v11  ;;  %361 = vmatpush.bf16.msra.mxu3 %v342_v11 }
  0x1a   :  { %172 = vmatpush.bf16.msra.mxu0 %v333_v12  ;;  %354 = vmatpush.bf16.msra.mxu2 %v333_v12 }
  0x1b   :  { %191 = vmatpush.bf16.msra.mxu1 %v341_v13  ;;  %362 = vmatpush.bf16.msra.mxu3 %v341_v13 }
  0x1e   :  { %173 = vmatpush.bf16.msra.mxu0 %v332_v14  ;;  %355 = vmatpush.bf16.msra.mxu2 %v332_v14 }
  0x1f   :  { %192 = vmatpush.bf16.msra.mxu1 %v340_v15  ;;  %363 = vmatpush.bf16.msra.mxu3 %v340_v15 }
  0x21   :  { %174 = vmatmul.bf16.vlgmr.msra.gmra.mxu0 %v251_v24  ;;  %179 = vmatmul.bf16.vlgmr.msra.gmra.mxu2 %v259_v25 }
  0x22   :  { %193 = vmatmul.bf16.vlgmr.msra.gmra.mxu1 %v255_v26  ;;  %198 = vmatmul.bf16.vlgmr.msra.gmra.mxu3 %v263_v27 }
  0x9e   :  { %v175_v28 = vpop.f32.mrf.mxu0 }
  0x9f   :  { %v194_v29 = vpop.f32.mrf.mxu1 }
  0xa0   :  { %v195_v30 = vadd.f32 %v194_v29, %v175_v28 }
  0xa2   :  { %204 = vst [vmem:[%s499_s2] sm:$0xff] %v195_v30  ;;  %208 = vadd.xlane.f32.xlu0 %v195_v30  ;;  %v216_v31 = vmul.f32 %v195_v30, %v195_v30 }
  0xa4   :  { %220 = vadd.xlane.f32.xlu2 %v216_v31  ;;  %v180_v32 = vpop.f32.mrf.mxu2 }
  0xa5   :  { %v199_v33 = vpop.f32.mrf.mxu3 }
  0xa6   :  { %v200_v34 = vadd.f32 %v199_v33, %v180_v32  ;;  %v177_v35 = vpop.f32.mrf.mxu0 }
  0xa7   :  { %v196_v36 = vpop.f32.mrf.mxu1 }
  0xa8   :  { %206 = vst [vmem:[%s499_s2 + $0x10] sm:$0xff] %v200_v34  ;;  %v197_v37 = vadd.f32 %v196_v36, %v177_v35  ;;  %212 = vadd.xlane.f32.xlu1 %v200_v34  ;;  %v218_v42 = vmul.f32 %v200_v34, %v200_v34 }
  0xaa   :  { %205 = vst [vmem:[%s499_s2 + $0x8] sm:$0xff] %v197_v37  ;;  %210 = vadd.xlane.f32.xlu0 %v197_v37  ;;  %v217_v38 = vmul.f32 %v197_v37, %v197_v37 }
  0xac   :  { %222 = vadd.xlane.f32.xlu2 %v217_v38  ;;  %v182_v39 = vpop.f32.mrf.mxu2 }
  0xad   :  { %v201_v40 = vpop.f32.mrf.mxu3 }
  0xae   :  { %v202_v41 = vadd.f32 %v201_v40, %v182_v39 }
  0xb0   :  { %207 = vst [vmem:[%s499_s2 + $0x18] sm:$0xff] %v202_v41  ;;  %214 = vadd.xlane.f32.xlu1 %v202_v41  ;;  %v219_v43 = vmul.f32 %v202_v41, %v202_v41 }
  0xb2   :  { %224 = vadd.xlane.f32.xlu0 %v218_v42 }
  0xb8   :  { %226 = vadd.xlane.f32.xlu1 %v219_v43 }
 0x115   :  { %v209_v44 = vpop.xlane.xlu0 %208 }
 0x116   :  { %228 = vst [vmem:[%s500_s3] sm:$0xff] %v209_v44 }
 0x117   :  { %v221_v45 = vpop.xlane.xlu2 %220 }
 0x118   :  { %232 = vst [vmem:[%s501_s4] sm:$0xff] %v221_v45 }
 0x11b   :  { %v213_v46 = vpop.xlane.xlu1 %212 }
 0x11c   :  { %230 = vst [vmem:[%s500_s3 + $0x10] sm:$0xff] %v213_v46 }
 0x11d   :  { %v211_v47 = vpop.xlane.xlu0 %210 }
 0x11e   :  { %229 = vst [vmem:[%s500_s3 + $0x8] sm:$0xff] %v211_v47 }
 0x11f   :  { %v223_v48 = vpop.xlane.xlu2 %222 }
 0x120   :  { %233 = vst [vmem:[%s501_s4 + $0x8] sm:$0xff] %v223_v48 }
 0x123   :  { %v215_v49 = vpop.xlane.xlu1 %214 }
 0x124   :  { %231 = vst [vmem:[%s500_s3 + $0x18] sm:$0xff] %v215_v49 }
 0x125   :  { %v225_v50 = vpop.xlane.xlu0 %224 }
 0x126   :  { %234 = vst [vmem:[%s501_s4 + $0x10] sm:$0xff] %v225_v50 }
 0x12b   :  { %v227_v51 = vpop.xlane.xlu1 %226 }
 0x12c   :  { %235 = vst [vmem:[%s501_s4 + $0x18] sm:$0xff] %v227_v51 }

// kernel: _lambda_.14
= control target key start
LH: loop header
LB: loop body
LE: loop exit
PB: predicated region body
PF: predicated region fallthrough
CT: control target
= control target key end

     0   :  { %v205_v0 = vmov 0   ;;  %s310_s1 = inlined_call_operand.vmem [shape: f32[64,1], index: 1, kind: input, shape index: {}]   ;;  %s311_s2 = inlined_call_operand.vmem [shape: f32[64,1], index: 2, kind: input, shape index: {}]   ;;  %s312_s0 = inlined_call_operand.vmem [shape: f32[64,128], index: 0, kind: input, shape index: {}]   ;;  %s313_s3 = inlined_call_operand.vmem [shape: bf16[64,128], index: 3, kind: output, shape index: {}]  }
   0x1   :  { %204 = vset.pattern.permute.xlu2 %v205_v0  ;;  %203 = vset.pattern.permute.xlu1 %v205_v0  ;;  %v26_v1 = vld [vmem:[%s310_s1 + $0x20] sm:$0xff]  ;;  %v24_v2 = vld [vmem:[%s310_s1 + $0x10] sm:$0xff]  ;;  %v27_v4 = vld [vmem:[%s310_s1 + $0x28] sm:$0xff] }
   0x2   :  { %v22_v3 = vld [vmem:[%s310_s1] sm:$0xff]  ;;  %202 = vset.pattern.permute.xlu0 %v205_v0  ;;  %52 = vperm.xlu2 %204, %v26_v1   ;;  %v25_v5 = vld [vmem:[%s310_s1 + $0x18] sm:$0xff]  ;;  %v23_v6 = vld [vmem:[%s310_s1 + $0x8] sm:$0xff] }
   0x3   :  { %42 = vperm.xlu1 %203, %v24_v2   ;;  %32 = vperm.xlu0 %202, %v22_v3   ;;  %v78_v7 = vld [vmem:[%s311_s2] sm:$0xff]  ;;  %v29_v8 = vld [vmem:[%s310_s1 + $0x38] sm:$0xff]  ;;  %v28_v9 = vld [vmem:[%s310_s1 + $0x30] sm:$0xff] }
   0x4   :  { %v81_v10 = vld [vmem:[%s311_s2 + $0x18] sm:$0xff]  ;;  %v80_v11 = vld [vmem:[%s311_s2 + $0x10] sm:$0xff]  ;;  %v79_v12 = vld [vmem:[%s311_s2 + $0x8] sm:$0xff] }
   0x5   :  { %v84_v13 = vld [vmem:[%s311_s2 + $0x30] sm:$0xff]  ;;  %v83_v14 = vld [vmem:[%s311_s2 + $0x28] sm:$0xff]  ;;  %v82_v15 = vld [vmem:[%s311_s2 + $0x20] sm:$0xff] }
   0x6   :  { %v85_v16 = vld [vmem:[%s311_s2 + $0x38] sm:$0xff]  ;;  %v14_v24 = vld [vmem:[%s312_s0] sm:$0xff]  ;;  %v16_v31 = vld [vmem:[%s312_s0 + $0x10] sm:$0xff] }
   0x7   :  { %v17_v25 = vld [vmem:[%s312_s0 + $0x18] sm:$0xff]  ;;  %v15_v32 = vld [vmem:[%s312_s0 + $0x8] sm:$0xff]  ;;  %v18_v45 = vld [vmem:[%s312_s0 + $0x20] sm:$0xff] }
   0x8   :  { %v19_v46 = vld [vmem:[%s312_s0 + $0x28] sm:$0xff]  ;;  %v20_v51 = vld [vmem:[%s312_s0 + $0x30] sm:$0xff]  ;;  %v21_v0 = vld [vmem:[%s312_s0 + $0x38] sm:$0xff] }
   0xa   :  { %57 = vperm.xlu2 %204, %v27_v4  }
   0xb   :  { %47 = vperm.xlu1 %203, %v25_v5   ;;  %37 = vperm.xlu0 %202, %v23_v6  }
  0x12   :  { %88 = vperm.xlu2 %204, %v78_v7  }
  0x13   :  { %67 = vperm.xlu1 %203, %v29_v8   ;;  %62 = vperm.xlu0 %202, %v28_v9  }
  0x1a   :  { %103 = vperm.xlu2 %204, %v81_v10  }
  0x1b   :  { %98 = vperm.xlu1 %203, %v80_v11   ;;  %93 = vperm.xlu0 %202, %v79_v12  }
  0x22   :  { %118 = vperm.xlu2 %204, %v84_v13  }
  0x23   :  { %113 = vperm.xlu1 %203, %v83_v14   ;;  %108 = vperm.xlu0 %202, %v82_v15  }
  0x2b   :  { %123 = vperm.xlu0 %202, %v85_v16  }
  0x5c   :  { %v53_v17 = vpop.permute.xlu2 %52 }
  0x5d   :  { %v74_v54 = vmul.f32 %v53_v17, %v18_v45 }
  0x64   :  { %v58_v18 = vpop.permute.xlu2 %57 }
  0x65   :  { %v75_v55 = vmul.f32 %v58_v18, %v19_v46 }
  0x6c   :  { %v89_v23 = vpop.permute.xlu2 %88 }
  0x74   :  { %v104_v30 = vpop.permute.xlu2 %103 }
  0x75   :  { %v43_v19 = vpop.permute.xlu1 %42  ;;  %v33_v20 = vpop.permute.xlu0 %32 }
  0x76   :  { %v70_v28 = vmul.f32 %v33_v20, %v14_v24  ;;  %v72_v35 = vmul.f32 %v43_v19, %v16_v31 }
  0x78   :  { %v126_v33 = vadd.f32 %v89_v23, %v70_v28 }
  0x7a   :  { %v142_v39 = vmul.f32 0.2, %v126_v33  ;;  %vm134_vm0 = vcmp.ge.f32.partialorder %v126_v33, 0.0 }
  0x7c   :  { %v150_v49 = vsel %vm134_vm0, %v126_v33, %v142_v39  ;;  %v119_v63 = vpop.permute.xlu2 %118 }
  0x7d   :  { %v48_v21 = vpop.permute.xlu1 %47  ;;  %v38_v22 = vpop.permute.xlu0 %37 }
  0x7e   :  { %v73_v29 = vmul.f32 %v48_v21, %v17_v25  ;;  %v71_v36 = vmul.f32 %v38_v22, %v15_v32 }
  0x80   :  { %v129_v34 = vadd.f32 %v104_v30, %v73_v29 }
  0x82   :  { %v145_v40 = vmul.f32 0.2, %v129_v34  ;;  %vm137_vm1 = vcmp.ge.f32.partialorder %v129_v34, 0.0 }
  0x84   :  { %v153_v48 = vsel %vm137_vm1, %v129_v34, %v145_v40 }
  0x85   :  { %v68_v26 = vpop.permute.xlu1 %67  ;;  %v63_v27 = vpop.permute.xlu0 %62 }
  0x86   :  { %v76_v58 = vmul.f32 %v63_v27, %v20_v51  ;;  %v77_v5 = vmul.f32 %v68_v26, %v21_v0 }
  0x88   :  { %v132_v1 = vadd.f32 %v119_v63, %v76_v58 }
  0x8a   :  { %v148_v7 = vmul.f32 0.2, %v132_v1  ;;  %vm140_vm6 = vcmp.ge.f32.partialorder %v132_v1, 0.0 }
  0x8c   :  { %v156_v10 = vsel %vm140_vm6, %v132_v1, %v148_v7 }
  0x8d   :  { %v99_v37 = vpop.permute.xlu1 %98  ;;  %v94_v38 = vpop.permute.xlu0 %93 }
  0x8e   :  { %v128_v41 = vadd.f32 %v99_v37, %v72_v35  ;;  %v127_v42 = vadd.f32 %v94_v38, %v71_v36 }
  0x90   :  { %vm136_vm2 = vcmp.ge.f32.partialorder %v128_v41, 0.0  ;;  %v144_v43 = vmul.f32 0.2, %v128_v41  ;;  %vm135_vm3 = vcmp.ge.f32.partialorder %v127_v42, 0.0  ;;  %v143_v44 = vmul.f32 0.2, %v127_v42 }
  0x92   :  { %v152_v47 = vsel %vm136_vm2, %v128_v41, %v144_v43  ;;  %v151_v50 = vsel %vm135_vm3, %v127_v42, %v143_v44 }
  0x93   :  { %v186_v52 = vpack.c.bf16 %v153_v48, %v152_v47  ;;  %v181_v53 = vpack.c.bf16 %v151_v50, %v150_v49 }
  0x95   :  { %198 = vst [vmem:[%s313_s3 + $0x8] sm:$0xff] %v186_v52   ;;  %v114_v56 = vpop.permute.xlu1 %113  ;;  %v109_v57 = vpop.permute.xlu0 %108 }
  0x96   :  { %182 = vst [vmem:[%s313_s3] sm:$0xff] %v181_v53   ;;  %v131_v59 = vadd.f32 %v114_v56, %v75_v55  ;;  %v130_v60 = vadd.f32 %v109_v57, %v74_v54 }
  0x98   :  { %vm139_vm4 = vcmp.ge.f32.partialorder %v131_v59, 0.0  ;;  %v147_v61 = vmul.f32 0.2, %v131_v59  ;;  %vm138_vm5 = vcmp.ge.f32.partialorder %v130_v60, 0.0  ;;  %v146_v62 = vmul.f32 0.2, %v130_v60 }
  0x9a   :  { %v155_v2 = vsel %vm139_vm4, %v131_v59, %v147_v61  ;;  %v154_v3 = vsel %vm138_vm5, %v130_v60, %v146_v62 }
  0x9b   :  { %v191_v4 = vpack.c.bf16 %v155_v2, %v154_v3 }
  0x9d   :  { %199 = vst [vmem:[%s313_s3 + $0x10] sm:$0xff] %v191_v4   ;;  %v124_v6 = vpop.permute.xlu0 %123 }
  0x9e   :  { %v133_v8 = vadd.f32 %v124_v6, %v77_v5 }
  0xa0   :  { %vm141_vm7 = vcmp.ge.f32.partialorder %v133_v8, 0.0  ;;  %v149_v9 = vmul.f32 0.2, %v133_v8 }
  0xa2   :  { %v157_v11 = vsel %vm141_vm7, %v133_v8, %v149_v9 }
  0xa3   :  { %v196_v12 = vpack.c.bf16 %v157_v11, %v156_v10 }
  0xa5   :  { %200 = vst [vmem:[%s313_s3 + $0x18] sm:$0xff] %v196_v12  }

// kernel: _lambda_.13
= control target key start
LH: loop header
LB: loop body
LE: loop exit
PB: predicated region body
PF: predicated region fallthrough
CT: control target
= control target key end

     0   :  { %s1087_s1 = inlined_call_operand.vmem [shape: bf16[512,128], index: 1, kind: input, shape index: {}]   ;;  %s1088_s0 = inlined_call_operand.vmem [shape: bf16[64,512], index: 0, kind: input, shape index: {}]   ;;  %s1089_s2 = inlined_call_operand.vmem [shape: f32[64,128], index: 2, kind: output, shape index: {0}]   ;;  %s1090_s3 = inlined_call_operand.vmem [shape: f32[64,128], index: 3, kind: output, shape index: {1}]   ;;  %s1091_s4 = inlined_call_operand.vmem [shape: f32[64,128], index: 4, kind: output, shape index: {2}]  }
   0x1   :  { %v773_v0 = vld [vmem:[%s1087_s1 + $0x38] sm:$0xff]  ;;  %v772_v4 = vld [vmem:[%s1087_s1 + $0x30] sm:$0xff]  ;;  %v771_v8 = vld [vmem:[%s1087_s1 + $0x28] sm:$0xff] }
   0x2   :  { %v781_v1 = vld [vmem:[%s1087_s1 + $0x78] sm:$0xff]  ;;  %366 = vmatpush.bf16.msra.mxu0 %v773_v0  ;;  %v780_v5 = vld [vmem:[%s1087_s1 + $0x70] sm:$0xff]  ;;  %v779_v9 = vld [vmem:[%s1087_s1 + $0x68] sm:$0xff] }
   0x3   :  { %v789_v2 = vld [vmem:[%s1087_s1 + $0xb8] sm:$0xff]  ;;  %395 = vmatpush.bf16.msra.mxu1 %v781_v1  ;;  %v788_v6 = vld [vmem:[%s1087_s1 + $0xb0] sm:$0xff]  ;;  %v787_v10 = vld [vmem:[%s1087_s1 + $0xa8] sm:$0xff] }
   0x4   :  { %v797_v3 = vld [vmem:[%s1087_s1 + $0xf8] sm:$0xff]  ;;  %424 = vmatpush.bf16.msra.mxu2 %v789_v2  ;;  %v796_v7 = vld [vmem:[%s1087_s1 + $0xf0] sm:$0xff]  ;;  %v795_v11 = vld [vmem:[%s1087_s1 + $0xe8] sm:$0xff] }
   0x5   :  { %453 = vmatpush.bf16.msra.mxu3 %v797_v3  ;;  %v770_v12 = vld [vmem:[%s1087_s1 + $0x20] sm:$0xff]  ;;  %v769_v16 = vld [vmem:[%s1087_s1 + $0x18] sm:$0xff]  ;;  %v768_v20 = vld [vmem:[%s1087_s1 + $0x10] sm:$0xff] }
   0x6   :  { %367 = vmatpush.bf16.msra.mxu0 %v772_v4  ;;  %v778_v13 = vld [vmem:[%s1087_s1 + $0x60] sm:$0xff]  ;;  %v777_v17 = vld [vmem:[%s1087_s1 + $0x58] sm:$0xff]  ;;  %v776_v21 = vld [vmem:[%s1087_s1 + $0x50] sm:$0xff] }
   0x7   :  { %396 = vmatpush.bf16.msra.mxu1 %v780_v5  ;;  %v786_v14 = vld [vmem:[%s1087_s1 + $0xa0] sm:$0xff]  ;;  %v785_v18 = vld [vmem:[%s1087_s1 + $0x98] sm:$0xff]  ;;  %v784_v22 = vld [vmem:[%s1087_s1 + $0x90] sm:$0xff] }
   0x8   :  { %425 = vmatpush.bf16.msra.mxu2 %v788_v6  ;;  %v794_v15 = vld [vmem:[%s1087_s1 + $0xe0] sm:$0xff]  ;;  %v793_v19 = vld [vmem:[%s1087_s1 + $0xd8] sm:$0xff]  ;;  %v792_v23 = vld [vmem:[%s1087_s1 + $0xd0] sm:$0xff] }
   0x9   :  { %454 = vmatpush.bf16.msra.mxu3 %v796_v7  ;;  %v767_v24 = vld [vmem:[%s1087_s1 + $0x8] sm:$0xff]  ;;  %v766_v28 = vld [vmem:[%s1087_s1] sm:$0xff]  ;;  %v752_v33 = vld [vmem:[%s1088_s0 + $0xc] sm:$0xf0] }
   0xa   :  { %368 = vmatpush.bf16.msra.mxu0 %v771_v8  ;;  %v775_v25 = vld [vmem:[%s1087_s1 + $0x48] sm:$0xff]  ;;  %v774_v29 = vld [vmem:[%s1087_s1 + $0x40] sm:$0xff]  ;;  %v562_v35 = vld [vmem:[%s1088_s0 + $0x10] sm:$0xf0] }
   0xb   :  { %397 = vmatpush.bf16.msra.mxu1 %v779_v9  ;;  %v783_v26 = vld [vmem:[%s1087_s1 + $0x88] sm:$0xff]  ;;  %v782_v30 = vld [vmem:[%s1087_s1 + $0x80] sm:$0xff]  ;;  %v753_v37 = vld [vmem:[%s1088_s0 + $0x14] sm:$0xf0] }
   0xc   :  { %426 = vmatpush.bf16.msra.mxu2 %v787_v10  ;;  %v791_v27 = vld [vmem:[%s1087_s1 + $0xc8] sm:$0xff]  ;;  %v790_v31 = vld [vmem:[%s1087_s1 + $0xc0] sm:$0xff]  ;;  %v570_v39 = vld [vmem:[%s1088_s0 + $0x18] sm:$0xf0] }
   0xd   :  { %455 = vmatpush.bf16.msra.mxu3 %v795_v11  ;;  %v560_v32 = vld [vmem:[%s1088_s0] sm:$0xf]  ;;  %v750_v34 = vld [vmem:[%s1088_s0 + $0x4] sm:$0xf]  ;;  %v568_v36 = vld [vmem:[%s1088_s0 + $0x8] sm:$0xf] }
   0xe   :  { %369 = vmatpush.bf16.msra.mxu0 %v770_v12  ;;  %v751_v38 = vld [vmem:[%s1088_s0 + $0xc] sm:$0xf]  ;;  %v561_v40 = vor.u32 %v752_v33, %v560_v32  ;;  %v565_v41 = vor.u32 %v750_v34, %v562_v35  ;;  %v569_v42 = vor.u32 %v753_v37, %v568_v36  ;;  %v576_v44 = vld [vmem:[%s1088_s0 + $0x20] sm:$0xf]  ;;  %v756_v45 = vld [vmem:[%s1088_s0 + $0x2c] sm:$0xf0] }
   0xf   :  { %398 = vmatpush.bf16.msra.mxu1 %v778_v13  ;;  %v573_v43 = vor.u32 %v751_v38, %v570_v39  ;;  %v754_v46 = vld [vmem:[%s1088_s0 + $0x24] sm:$0xf]  ;;  %v578_v47 = vld [vmem:[%s1088_s0 + $0x30] sm:$0xf0]  ;;  %v584_v48 = vld [vmem:[%s1088_s0 + $0x28] sm:$0xf]  ;;  %v577_v52 = vor.u32 %v756_v45, %v576_v44 }
  0x10   :  { %427 = vmatpush.bf16.msra.mxu2 %v786_v14  ;;  %v757_v49 = vld [vmem:[%s1088_s0 + $0x34] sm:$0xf0]  ;;  %v755_v50 = vld [vmem:[%s1088_s0 + $0x2c] sm:$0xf]  ;;  %v586_v51 = vld [vmem:[%s1088_s0 + $0x38] sm:$0xf0]  ;;  %v581_v53 = vor.u32 %v754_v46, %v578_v47 }
  0x11   :  { %456 = vmatpush.bf16.msra.mxu3 %v794_v15  ;;  %v585_v54 = vor.u32 %v757_v49, %v584_v48  ;;  %v589_v55 = vor.u32 %v755_v50, %v586_v51  ;;  %v592_v56 = vld [vmem:[%s1088_s0 + $0x40] sm:$0xf]  ;;  %v760_v57 = vld [vmem:[%s1088_s0 + $0x4c] sm:$0xf0]  ;;  %v758_v58 = vld [vmem:[%s1088_s0 + $0x44] sm:$0xf] }
  0x12   :  { %370 = vmatpush.bf16.msra.mxu0 %v769_v16  ;;  %v594_v59 = vld [vmem:[%s1088_s0 + $0x50] sm:$0xf0]  ;;  %v600_v60 = vld [vmem:[%s1088_s0 + $0x48] sm:$0xf]  ;;  %v761_v61 = vld [vmem:[%s1088_s0 + $0x54] sm:$0xf0]  ;;  %v593_v0 = vor.u32 %v760_v57, %v592_v56 }
  0x13   :  { %399 = vmatpush.bf16.msra.mxu1 %v777_v17  ;;  %v759_v62 = vld [vmem:[%s1088_s0 + $0x4c] sm:$0xf]  ;;  %v602_v63 = vld [vmem:[%s1088_s0 + $0x58] sm:$0xf0]  ;;  %v597_v1 = vor.u32 %v758_v58, %v594_v59  ;;  %v601_v2 = vor.u32 %v761_v61, %v600_v60  ;;  %v608_v4 = vld [vmem:[%s1088_s0 + $0x60] sm:$0xf] }
  0x14   :  { %428 = vmatpush.bf16.msra.mxu2 %v785_v18  ;;  %v605_v3 = vor.u32 %v759_v62, %v602_v63  ;;  %v764_v5 = vld [vmem:[%s1088_s0 + $0x6c] sm:$0xf0]  ;;  %v762_v6 = vld [vmem:[%s1088_s0 + $0x64] sm:$0xf]  ;;  %v610_v7 = vld [vmem:[%s1088_s0 + $0x70] sm:$0xf0] }
  0x15   :  { %457 = vmatpush.bf16.msra.mxu3 %v793_v19  ;;  %v616_v8 = vld [vmem:[%s1088_s0 + $0x68] sm:$0xf]  ;;  %v765_v9 = vld [vmem:[%s1088_s0 + $0x74] sm:$0xf0]  ;;  %v763_v10 = vld [vmem:[%s1088_s0 + $0x6c] sm:$0xf]  ;;  %v609_v12 = vor.u32 %v764_v5, %v608_v4  ;;  %v613_v13 = vor.u32 %v762_v6, %v610_v7 }
  0x16   :  { %371 = vmatpush.bf16.msra.mxu0 %v768_v20  ;;  %v618_v11 = vld [vmem:[%s1088_s0 + $0x78] sm:$0xf0]  ;;  %v617_v14 = vor.u32 %v765_v9, %v616_v8 }
  0x17   :  { %400 = vmatpush.bf16.msra.mxu1 %v776_v21  ;;  %v621_v15 = vor.u32 %v763_v10, %v618_v11 }
  0x18   :  { %429 = vmatpush.bf16.msra.mxu2 %v784_v22 }
  0x19   :  { %458 = vmatpush.bf16.msra.mxu3 %v792_v23 }
  0x1a   :  { %372 = vmatpush.bf16.msra.mxu0 %v767_v24 }
  0x1b   :  { %401 = vmatpush.bf16.msra.mxu1 %v775_v25 }
  0x1c   :  { %430 = vmatpush.bf16.msra.mxu2 %v783_v26 }
  0x1d   :  { %459 = vmatpush.bf16.msra.mxu3 %v791_v27 }
  0x1e   :  { %373 = vmatpush.bf16.msra.mxu0 %v766_v28 }
  0x1f   :  { %402 = vmatpush.bf16.msra.mxu1 %v774_v29 }
  0x20   :  { %431 = vmatpush.bf16.msra.mxu2 %v782_v30 }
  0x21   :  { %460 = vmatpush.bf16.msra.mxu3 %v790_v31  ;;  %374 = vmatmul.bf16.vlgmr.msra.gmra.mxu0 %v561_v40 }
  0x22   :  { %403 = vmatmul.bf16.vlgmr.msra.gmra.mxu1 %v565_v41 }
  0x23   :  { %432 = vmatmul.bf16.vlgmr.msra.gmra.mxu2 %v569_v42 }
  0x24   :  { %461 = vmatmul.bf16.vlgmr.msra.gmra.mxu3 %v573_v43 }
  0x31   :  { %379 = vmatmul.bf16.gmra.mxu0 %v577_v52 }
  0x32   :  { %408 = vmatmul.bf16.gmra.mxu1 %v581_v53 }
  0x33   :  { %437 = vmatmul.bf16.gmra.mxu2 %v585_v54 }
  0x34   :  { %466 = vmatmul.bf16.gmra.mxu3 %v589_v55 }
  0x41   :  { %384 = vmatmul.bf16.gmra.mxu0 %v593_v0 }
  0x42   :  { %413 = vmatmul.bf16.gmra.mxu1 %v597_v1 }
  0x43   :  { %442 = vmatmul.bf16.gmra.mxu2 %v601_v2 }
  0x44   :  { %471 = vmatmul.bf16.gmra.mxu3 %v605_v3 }
  0x51   :  { %389 = vmatmul.bf16.gmra.mxu0 %v609_v12 }
  0x52   :  { %418 = vmatmul.bf16.gmra.mxu1 %v613_v13 }
  0x53   :  { %447 = vmatmul.bf16.gmra.mxu2 %v617_v14 }
  0x54   :  { %476 = vmatmul.bf16.gmra.mxu3 %v621_v15 }
  0x9e   :  { %v375_v16 = vpop.f32.mrf.mxu0 }
  0x9f   :  { %v404_v17 = vpop.f32.mrf.mxu1 }
  0xa0   :  { %v405_v18 = vadd.f32 %v404_v17, %v375_v16 }
  0xa6   :  { %v433_v19 = vpop.f32.mrf.mxu2  ;;  %v377_v22 = vpop.f32.mrf.mxu0 }
  0xa7   :  { %v462_v20 = vpop.f32.mrf.mxu3  ;;  %v434_v21 = vadd.f32 %v433_v19, %v405_v18  ;;  %v406_v23 = vpop.f32.mrf.mxu1 }
  0xa8   :  { %v407_v26 = vadd.f32 %v406_v23, %v377_v22 }
  0xa9   :  { %v463_v24 = vadd.f32 %v462_v20, %v434_v21 }
  0xab   :  { %482 = vst [vmem:[%s1089_s2] sm:$0xff] %v463_v24  ;;  %490 = vadd.xlane.f32.xlu0 %v463_v24  ;;  %v506_v25 = vmul.f32 %v463_v24, %v463_v24 }
  0xad   :  { %514 = vadd.xlane.f32.xlu2 %v506_v25 }
  0xae   :  { %v435_v27 = vpop.f32.mrf.mxu2  ;;  %v380_v30 = vpop.f32.mrf.mxu0 }
  0xaf   :  { %v464_v28 = vpop.f32.mrf.mxu3  ;;  %v436_v29 = vadd.f32 %v435_v27, %v407_v26  ;;  %v409_v31 = vpop.f32.mrf.mxu1 }
  0xb0   :  { %v410_v33 = vadd.f32 %v409_v31, %v380_v30 }
  0xb1   :  { %v465_v32 = vadd.f32 %v464_v28, %v436_v29 }
  0xb3   :  { %483 = vst [vmem:[%s1089_s2 + $0x8] sm:$0xff] %v465_v32  ;;  %492 = vadd.xlane.f32.xlu0 %v465_v32  ;;  %v507_v40 = vmul.f32 %v465_v32, %v465_v32 }
  0xb6   :  { %v438_v34 = vpop.f32.mrf.mxu2  ;;  %v382_v37 = vpop.f32.mrf.mxu0 }
  0xb7   :  { %v467_v35 = vpop.f32.mrf.mxu3  ;;  %v439_v36 = vadd.f32 %v438_v34, %v410_v33  ;;  %v411_v38 = vpop.f32.mrf.mxu1 }
  0xb8   :  { %v412_v41 = vadd.f32 %v411_v38, %v382_v37 }
  0xb9   :  { %v468_v39 = vadd.f32 %v467_v35, %v439_v36 }
  0xbb   :  { %484 = vst [vmem:[%s1089_s2 + $0x10] sm:$0xff] %v468_v39  ;;  %494 = vadd.xlane.f32.xlu1 %v468_v39  ;;  %516 = vadd.xlane.f32.xlu0 %v507_v40  ;;  %v508_v48 = vmul.f32 %v468_v39, %v468_v39 }
  0xbe   :  { %v440_v42 = vpop.f32.mrf.mxu2  ;;  %v385_v45 = vpop.f32.mrf.mxu0 }
  0xbf   :  { %v469_v43 = vpop.f32.mrf.mxu3  ;;  %v441_v44 = vadd.f32 %v440_v42, %v412_v41  ;;  %v414_v46 = vpop.f32.mrf.mxu1 }
  0xc0   :  { %v415_v49 = vadd.f32 %v414_v46, %v385_v45 }
  0xc1   :  { %v470_v47 = vadd.f32 %v469_v43, %v441_v44 }
  0xc3   :  { %485 = vst [vmem:[%s1089_s2 + $0x18] sm:$0xff] %v470_v47  ;;  %518 = vadd.xlane.f32.xlu1 %v508_v48  ;;  %v509_v50 = vmul.f32 %v470_v47, %v470_v47 }
  0xc5   :  { %520 = vadd.xlane.f32.xlu2 %v509_v50 }
  0xc6   :  { %v443_v51 = vpop.f32.mrf.mxu2  ;;  %v387_v54 = vpop.f32.mrf.mxu0 }
  0xc7   :  { %v472_v52 = vpop.f32.mrf.mxu3  ;;  %v444_v53 = vadd.f32 %v443_v51, %v415_v49  ;;  %v416_v55 = vpop.f32.mrf.mxu1 }
  0xc8   :  { %v417_v58 = vadd.f32 %v416_v55, %v387_v54 }
  0xc9   :  { %v473_v56 = vadd.f32 %v472_v52, %v444_v53 }
  0xcb   :  { %486 = vst [vmem:[%s1089_s2 + $0x20] sm:$0xff] %v473_v56  ;;  %496 = vadd.xlane.f32.xlu1 %v470_v47  ;;  %v510_v57 = vmul.f32 %v473_v56, %v473_v56 }
  0xcd   :  { %522 = vadd.xlane.f32.xlu0 %v510_v57  ;;  %498 = vadd.xlane.f32.xlu2 %v473_v56 }
  0xce   :  { %v445_v59 = vpop.f32.mrf.mxu2  ;;  %v390_v62 = vpop.f32.mrf.mxu0 }
  0xcf   :  { %v474_v60 = vpop.f32.mrf.mxu3  ;;  %v446_v61 = vadd.f32 %v445_v59, %v417_v58  ;;  %v419_v63 = vpop.f32.mrf.mxu1 }
  0xd0   :  { %v420_v1 = vadd.f32 %v419_v63, %v390_v62 }
  0xd1   :  { %v475_v0 = vadd.f32 %v474_v60, %v446_v61 }
  0xd3   :  { %487 = vst [vmem:[%s1089_s2 + $0x28] sm:$0xff] %v475_v0  ;;  %v511_v15 = vmul.f32 %v475_v0, %v475_v0 }
  0xd5   :  { %500 = vadd.xlane.f32.xlu2 %v475_v0 }
  0xd6   :  { %v448_v2 = vpop.f32.mrf.mxu2  ;;  %v392_v6 = vpop.f32.mrf.mxu0 }
  0xd7   :  { %v477_v3 = vpop.f32.mrf.mxu3  ;;  %v449_v4 = vadd.f32 %v448_v2, %v420_v1  ;;  %v421_v7 = vpop.f32.mrf.mxu1 }
  0xd8   :  { %v422_v9 = vadd.f32 %v421_v7, %v392_v6 }
  0xd9   :  { %v478_v5 = vadd.f32 %v477_v3, %v449_v4 }
  0xdb   :  { %488 = vst [vmem:[%s1089_s2 + $0x30] sm:$0xff] %v478_v5  ;;  %502 = vadd.xlane.f32.xlu0 %v478_v5  ;;  %v512_v8 = vmul.f32 %v478_v5, %v478_v5 }
  0xdd   :  { %526 = vadd.xlane.f32.xlu2 %v512_v8 }
  0xde   :  { %v450_v10 = vpop.f32.mrf.mxu2 }
  0xdf   :  { %v451_v11 = vadd.f32 %v450_v10, %v422_v9  ;;  %v479_v12 = vpop.f32.mrf.mxu3 }
  0xe1   :  { %v480_v13 = vadd.f32 %v479_v12, %v451_v11 }
  0xe3   :  { %489 = vst [vmem:[%s1089_s2 + $0x38] sm:$0xff] %v480_v13  ;;  %504 = vadd.xlane.f32.xlu1 %v480_v13  ;;  %v513_v14 = vmul.f32 %v480_v13, %v480_v13 }
  0xe5   :  { %528 = vadd.xlane.f32.xlu0 %v513_v14 }
  0xeb   :  { %524 = vadd.xlane.f32.xlu1 %v511_v15 }
 0x11e   :  { %v491_v16 = vpop.xlane.xlu0 %490 }
 0x11f   :  { %530 = vst [vmem:[%s1090_s3] sm:$0xff] %v491_v16 }
 0x120   :  { %v515_v17 = vpop.xlane.xlu2 %514 }
 0x121   :  { %538 = vst [vmem:[%s1091_s4] sm:$0xff] %v515_v17 }
 0x126   :  { %v493_v18 = vpop.xlane.xlu0 %492 }
 0x127   :  { %531 = vst [vmem:[%s1090_s3 + $0x8] sm:$0xff] %v493_v18 }
 0x12e   :  { %v495_v19 = vpop.xlane.xlu1 %494  ;;  %v517_v20 = vpop.xlane.xlu0 %516 }
 0x12f   :  { %532 = vst [vmem:[%s1090_s3 + $0x10] sm:$0xff] %v495_v19 }
 0x130   :  { %539 = vst [vmem:[%s1091_s4 + $0x8] sm:$0xff] %v517_v20 }
 0x136   :  { %v519_v21 = vpop.xlane.xlu1 %518 }
 0x137   :  { %540 = vst [vmem:[%s1091_s4 + $0x10] sm:$0xff] %v519_v21 }
 0x138   :  { %v521_v22 = vpop.xlane.xlu2 %520 }
 0x139   :  { %541 = vst [vmem:[%s1091_s4 + $0x18] sm:$0xff] %v521_v22 }
 0x13e   :  { %v497_v23 = vpop.xlane.xlu1 %496 }
 0x13f   :  { %533 = vst [vmem:[%s1090_s3 + $0x18] sm:$0xff] %v497_v23 }
 0x140   :  { %v523_v24 = vpop.xlane.xlu0 %522  ;;  %v499_v25 = vpop.xlane.xlu2 %498 }
 0x141   :  { %542 = vst [vmem:[%s1091_s4 + $0x20] sm:$0xff] %v523_v24 }
 0x142   :  { %534 = vst [vmem:[%s1090_s3 + $0x20] sm:$0xff] %v499_v25 }
 0x148   :  { %v501_v26 = vpop.xlane.xlu2 %500 }
 0x149   :  { %535 = vst [vmem:[%s1090_s3 + $0x28] sm:$0xff] %v501_v26 }
 0x14e   :  { %v503_v27 = vpop.xlane.xlu0 %502 }
 0x14f   :  { %536 = vst [vmem:[%s1090_s3 + $0x30] sm:$0xff] %v503_v27 }
 0x150   :  { %v527_v28 = vpop.xlane.xlu2 %526 }
 0x151   :  { %544 = vst [vmem:[%s1091_s4 + $0x30] sm:$0xff] %v527_v28 }
 0x156   :  { %v505_v29 = vpop.xlane.xlu1 %504 }
 0x157   :  { %537 = vst [vmem:[%s1090_s3 + $0x38] sm:$0xff] %v505_v29 }
 0x158   :  { %v529_v30 = vpop.xlane.xlu0 %528 }
 0x159   :  { %545 = vst [vmem:[%s1091_s4 + $0x38] sm:$0xff] %v529_v30 }
 0x15e   :  { %v525_v31 = vpop.xlane.xlu1 %524 }
 0x15f   :  { %543 = vst [vmem:[%s1091_s4 + $0x28] sm:$0xff] %v525_v31 }

// kernel: _lambda_.15
= control target key start
LH: loop header
LB: loop body
LE: loop exit
PB: predicated region body
PF: predicated region fallthrough
CT: control target
= control target key end

     0   :  { %v995_v41 = vmov 0   ;;  %s1226_s1 = inlined_call_operand.vmem [shape: bf16[1024,128], index: 1, kind: input, shape index: {}]   ;;  %s1227_s0 = inlined_call_operand.vmem [shape: bf16[8,1024], index: 0, kind: input, shape index: {}]   ;;  %s1228_s2 = inlined_call_operand.vmem [shape: f32[8,1], index: 2, kind: input, shape index: {}]   ;;  %s1229_s3 = inlined_call_operand.vmem [shape: f32[8,128], index: 3, kind: output, shape index: {}]  }
   0x1   :  { %v936_v0 = vld [vmem:[%s1226_s1 + $0x38] sm:$0xff]  ;;  %v935_v4 = vld [vmem:[%s1226_s1 + $0x30] sm:$0xff]  ;;  %v934_v8 = vld [vmem:[%s1226_s1 + $0x28] sm:$0xff]  ;;  %994 = vset.pattern.permute.xlu0 %v995_v41 }
   0x2   :  { %v944_v1 = vld [vmem:[%s1226_s1 + $0x78] sm:$0xff]  ;;  %564 = vmatpush.bf16.msra.mxu0 %v936_v0  ;;  %v943_v5 = vld [vmem:[%s1226_s1 + $0x70] sm:$0xff]  ;;  %v942_v9 = vld [vmem:[%s1226_s1 + $0x68] sm:$0xff] }
   0x3   :  { %v952_v2 = vld [vmem:[%s1226_s1 + $0xb8] sm:$0xff]  ;;  %577 = vmatpush.bf16.msra.mxu1 %v944_v1  ;;  %v951_v6 = vld [vmem:[%s1226_s1 + $0xb0] sm:$0xff]  ;;  %v950_v10 = vld [vmem:[%s1226_s1 + $0xa8] sm:$0xff] }
   0x4   :  { %v960_v3 = vld [vmem:[%s1226_s1 + $0xf8] sm:$0xff]  ;;  %590 = vmatpush.bf16.msra.mxu2 %v952_v2  ;;  %v959_v7 = vld [vmem:[%s1226_s1 + $0xf0] sm:$0xff]  ;;  %v958_v11 = vld [vmem:[%s1226_s1 + $0xe8] sm:$0xff] }
   0x5   :  { %603 = vmatpush.bf16.msra.mxu3 %v960_v3  ;;  %v933_v12 = vld [vmem:[%s1226_s1 + $0x20] sm:$0xff]  ;;  %v932_v16 = vld [vmem:[%s1226_s1 + $0x18] sm:$0xff]  ;;  %v931_v20 = vld [vmem:[%s1226_s1 + $0x10] sm:$0xff] }
   0x6   :  { %565 = vmatpush.bf16.msra.mxu0 %v935_v4  ;;  %v941_v13 = vld [vmem:[%s1226_s1 + $0x60] sm:$0xff]  ;;  %v940_v17 = vld [vmem:[%s1226_s1 + $0x58] sm:$0xff]  ;;  %v939_v21 = vld [vmem:[%s1226_s1 + $0x50] sm:$0xff] }
   0x7   :  { %578 = vmatpush.bf16.msra.mxu1 %v943_v5  ;;  %v949_v14 = vld [vmem:[%s1226_s1 + $0xa0] sm:$0xff]  ;;  %v948_v18 = vld [vmem:[%s1226_s1 + $0x98] sm:$0xff]  ;;  %v947_v22 = vld [vmem:[%s1226_s1 + $0x90] sm:$0xff] }
   0x8   :  { %591 = vmatpush.bf16.msra.mxu2 %v951_v6  ;;  %v957_v15 = vld [vmem:[%s1226_s1 + $0xe0] sm:$0xff]  ;;  %v956_v19 = vld [vmem:[%s1226_s1 + $0xd8] sm:$0xff]  ;;  %v955_v23 = vld [vmem:[%s1226_s1 + $0xd0] sm:$0xff] }
   0x9   :  { %604 = vmatpush.bf16.msra.mxu3 %v959_v7  ;;  %v930_v24 = vld [vmem:[%s1226_s1 + $0x8] sm:$0xff]  ;;  %v14_v29 = vld [vmem:[%s1227_s0] sm:$0xff]  ;;  %v968_v39 = vld [vmem:[%s1226_s1 + $0x138] sm:$0xff] }
   0xa   :  { %566 = vmatpush.bf16.msra.mxu0 %v934_v8  ;;  %v938_v25 = vld [vmem:[%s1226_s1 + $0x48] sm:$0xff]  ;;  %v929_v30 = vld [vmem:[%s1226_s1] sm:$0xff]  ;;  %v156_v37 = vunpack.c.l.b16 %v14_v29  ;;  %v157_v38 = vunpack.c.h.b16 %v14_v29  ;;  %v976_v40 = vld [vmem:[%s1226_s1 + $0x178] sm:$0xff] }
   0xb   :  { %579 = vmatpush.bf16.msra.mxu1 %v942_v9  ;;  %v946_v26 = vld [vmem:[%s1226_s1 + $0x88] sm:$0xff]  ;;  %v937_v31 = vld [vmem:[%s1226_s1 + $0x40] sm:$0xff]  ;;  %v984_v42 = vld [vmem:[%s1226_s1 + $0x1b8] sm:$0xff] }
   0xc   :  { %592 = vmatpush.bf16.msra.mxu2 %v950_v10  ;;  %v954_v27 = vld [vmem:[%s1226_s1 + $0xc8] sm:$0xff]  ;;  %v146_v34 = vld [vmem:[%s1228_s2] sm:$0xff]  ;;  %v992_v43 = vld [vmem:[%s1226_s1 + $0x1f8] sm:$0xff]  ;;  %v164_v46 = vpack.c.b16 %v156_v37, %v156_v37  ;;  %v165_v47 = vpack.c.b16 %v157_v38, %v157_v38 }
   0xd   :  { %605 = vmatpush.bf16.msra.mxu3 %v958_v11  ;;  %v15_v28 = vld [vmem:[%s1227_s0 + $0x8] sm:$0xff]  ;;  %v945_v35 = vld [vmem:[%s1226_s1 + $0x80] sm:$0xff]  ;;  %149 = vperm.xlu0 %994, %v146_v34   ;;  %v967_v48 = vld [vmem:[%s1226_s1 + $0x130] sm:$0xff] }
   0xe   :  { %567 = vmatpush.bf16.msra.mxu0 %v933_v12  ;;  %v158_v32 = vunpack.c.l.b16 %v15_v28  ;;  %v159_v33 = vunpack.c.h.b16 %v15_v28  ;;  %v953_v36 = vld [vmem:[%s1226_s1 + $0xc0] sm:$0xff]  ;;  %v975_v49 = vld [vmem:[%s1226_s1 + $0x170] sm:$0xff]  ;;  %v966_v52 = vld [vmem:[%s1226_s1 + $0x128] sm:$0xff] }
   0xf   :  { %580 = vmatpush.bf16.msra.mxu1 %v941_v13  ;;  %v983_v50 = vld [vmem:[%s1226_s1 + $0x1b0] sm:$0xff]  ;;  %v974_v53 = vld [vmem:[%s1226_s1 + $0x168] sm:$0xff]  ;;  %v965_v56 = vld [vmem:[%s1226_s1 + $0x120] sm:$0xff] }
  0x10   :  { %593 = vmatpush.bf16.msra.mxu2 %v949_v14  ;;  %v166_v44 = vpack.c.b16 %v158_v32, %v158_v32  ;;  %v167_v45 = vpack.c.b16 %v159_v33, %v159_v33  ;;  %v991_v51 = vld [vmem:[%s1226_s1 + $0x1f0] sm:$0xff]  ;;  %v982_v54 = vld [vmem:[%s1226_s1 + $0x1a8] sm:$0xff]  ;;  %v973_v57 = vld [vmem:[%s1226_s1 + $0x160] sm:$0xff] }
  0x11   :  { %606 = vmatpush.bf16.msra.mxu3 %v957_v15  ;;  %v990_v55 = vld [vmem:[%s1226_s1 + $0x1e8] sm:$0xff]  ;;  %v981_v58 = vld [vmem:[%s1226_s1 + $0x1a0] sm:$0xff]  ;;  %v964_v60 = vld [vmem:[%s1226_s1 + $0x118] sm:$0xff] }
  0x12   :  { %568 = vmatpush.bf16.msra.mxu0 %v932_v16  ;;  %v989_v59 = vld [vmem:[%s1226_s1 + $0x1e0] sm:$0xff]  ;;  %v972_v61 = vld [vmem:[%s1226_s1 + $0x158] sm:$0xff]  ;;  %v963_v0 = vld [vmem:[%s1226_s1 + $0x110] sm:$0xff] }
  0x13   :  { %581 = vmatpush.bf16.msra.mxu1 %v940_v17  ;;  %v980_v62 = vld [vmem:[%s1226_s1 + $0x198] sm:$0xff]  ;;  %v971_v1 = vld [vmem:[%s1226_s1 + $0x150] sm:$0xff]  ;;  %v962_v4 = vld [vmem:[%s1226_s1 + $0x108] sm:$0xff] }
  0x14   :  { %594 = vmatpush.bf16.msra.mxu2 %v948_v18  ;;  %v988_v63 = vld [vmem:[%s1226_s1 + $0x1d8] sm:$0xff]  ;;  %v979_v2 = vld [vmem:[%s1226_s1 + $0x190] sm:$0xff]  ;;  %v970_v5 = vld [vmem:[%s1226_s1 + $0x148] sm:$0xff] }
  0x15   :  { %607 = vmatpush.bf16.msra.mxu3 %v956_v19  ;;  %v987_v3 = vld [vmem:[%s1226_s1 + $0x1d0] sm:$0xff]  ;;  %v978_v7 = vld [vmem:[%s1226_s1 + $0x188] sm:$0xff]  ;;  %v17_v9 = vld [vmem:[%s1227_s0 + $0x18] sm:$0xff] }
  0x16   :  { %569 = vmatpush.bf16.msra.mxu0 %v931_v20  ;;  %v16_v6 = vld [vmem:[%s1227_s0 + $0x10] sm:$0xff]  ;;  %v986_v8 = vld [vmem:[%s1226_s1 + $0x1c8] sm:$0xff]  ;;  %v961_v12 = vld [vmem:[%s1226_s1 + $0x100] sm:$0xff]  ;;  %v162_v14 = vunpack.c.l.b16 %v17_v9  ;;  %v163_v15 = vunpack.c.h.b16 %v17_v9 }
  0x17   :  { %582 = vmatpush.bf16.msra.mxu1 %v939_v21  ;;  %v160_v10 = vunpack.c.l.b16 %v16_v6  ;;  %v161_v11 = vunpack.c.h.b16 %v16_v6  ;;  %v969_v13 = vld [vmem:[%s1226_s1 + $0x140] sm:$0xff] }
  0x18   :  { %595 = vmatpush.bf16.msra.mxu2 %v947_v22  ;;  %v977_v16 = vld [vmem:[%s1226_s1 + $0x180] sm:$0xff]  ;;  %v170_v20 = vpack.c.b16 %v162_v14, %v162_v14  ;;  %v171_v21 = vpack.c.b16 %v163_v15, %v163_v15 }
  0x19   :  { %608 = vmatpush.bf16.msra.mxu3 %v955_v23  ;;  %v985_v17 = vld [vmem:[%s1226_s1 + $0x1c0] sm:$0xff]  ;;  %v168_v18 = vpack.c.b16 %v160_v10, %v160_v10  ;;  %v169_v19 = vpack.c.b16 %v161_v11, %v161_v11 }
  0x1a   :  { %570 = vmatpush.bf16.msra.mxu0 %v930_v24 }
  0x1b   :  { %583 = vmatpush.bf16.msra.mxu1 %v938_v25 }
  0x1c   :  { %596 = vmatpush.bf16.msra.mxu2 %v946_v26 }
  0x1d   :  { %609 = vmatpush.bf16.msra.mxu3 %v954_v27 }
  0x1e   :  { %571 = vmatpush.bf16.msra.mxu0 %v929_v30 }
  0x1f   :  { %584 = vmatpush.bf16.msra.mxu1 %v937_v31 }
  0x20   :  { %597 = vmatpush.bf16.msra.mxu2 %v945_v35 }
  0x21   :  { %610 = vmatpush.bf16.msra.mxu3 %v953_v36  ;;  %572 = vmatmul.bf16.vlgmr.msra.gmra.mxu0 %v164_v46 }
  0x22   :  { %616 = vmatpush.bf16.msrb.mxu0 %v968_v39  ;;  %585 = vmatmul.bf16.vlgmr.msra.gmra.mxu1 %v165_v47 }
  0x23   :  { %629 = vmatpush.bf16.msrb.mxu1 %v976_v40  ;;  %598 = vmatmul.bf16.vlgmr.msra.gmra.mxu2 %v166_v44 }
  0x24   :  { %642 = vmatpush.bf16.msrb.mxu2 %v984_v42  ;;  %611 = vmatmul.bf16.vlgmr.msra.gmra.mxu3 %v167_v45 }
  0x25   :  { %655 = vmatpush.bf16.msrb.mxu3 %v992_v43 }
  0x26   :  { %617 = vmatpush.bf16.msrb.mxu0 %v967_v48 }
  0x27   :  { %630 = vmatpush.bf16.msrb.mxu1 %v975_v49 }
  0x28   :  { %643 = vmatpush.bf16.msrb.mxu2 %v983_v50 }
  0x29   :  { %656 = vmatpush.bf16.msrb.mxu3 %v991_v51 }
  0x2a   :  { %618 = vmatpush.bf16.msrb.mxu0 %v966_v52 }
  0x2b   :  { %631 = vmatpush.bf16.msrb.mxu1 %v974_v53 }
  0x2c   :  { %644 = vmatpush.bf16.msrb.mxu2 %v982_v54 }
  0x2d   :  { %657 = vmatpush.bf16.msrb.mxu3 %v990_v55 }
  0x2e   :  { %619 = vmatpush.bf16.msrb.mxu0 %v965_v56 }
  0x2f   :  { %632 = vmatpush.bf16.msrb.mxu1 %v973_v57 }
  0x30   :  { %645 = vmatpush.bf16.msrb.mxu2 %v981_v58 }
  0x31   :  { %658 = vmatpush.bf16.msrb.mxu3 %v989_v59 }
  0x32   :  { %620 = vmatpush.bf16.msrb.mxu0 %v964_v60 }
  0x33   :  { %633 = vmatpush.bf16.msrb.mxu1 %v972_v61 }
  0x34   :  { %646 = vmatpush.bf16.msrb.mxu2 %v980_v62 }
  0x35   :  { %659 = vmatpush.bf16.msrb.mxu3 %v988_v63 }
  0x36   :  { %621 = vmatpush.bf16.msrb.mxu0 %v963_v0 }
  0x37   :  { %634 = vmatpush.bf16.msrb.mxu1 %v971_v1 }
  0x38   :  { %647 = vmatpush.bf16.msrb.mxu2 %v979_v2 }
  0x39   :  { %660 = vmatpush.bf16.msrb.mxu3 %v987_v3 }
  0x3a   :  { %622 = vmatpush.bf16.msrb.mxu0 %v962_v4 }
  0x3b   :  { %635 = vmatpush.bf16.msrb.mxu1 %v970_v5 }
  0x3c   :  { %648 = vmatpush.bf16.msrb.mxu2 %v978_v7 }
  0x3d   :  { %661 = vmatpush.bf16.msrb.mxu3 %v986_v8 }
  0x3e   :  { %623 = vmatpush.bf16.msrb.mxu0 %v961_v12 }
  0x3f   :  { %636 = vmatpush.bf16.msrb.mxu1 %v969_v13 }
  0x40   :  { %649 = vmatpush.bf16.msrb.mxu2 %v977_v16 }
  0x41   :  { %662 = vmatpush.bf16.msrb.mxu3 %v985_v17  ;;  %624 = vmatmul.bf16.vlgmr.msrb.gmra.mxu0 %v168_v18 }
  0x42   :  { %637 = vmatmul.bf16.vlgmr.msrb.gmra.mxu1 %v169_v19 }
  0x43   :  { %650 = vmatmul.bf16.vlgmr.msrb.gmra.mxu2 %v170_v20 }
  0x44   :  { %663 = vmatmul.bf16.vlgmr.msrb.gmra.mxu3 %v171_v21 }
  0x7f   :  { %v150_v28 = vpop.permute.xlu0 %149 }
  0x9e   :  { %v573_v22 = vpop.f32.mrf.mxu0 }
  0x9f   :  { %v586_v23 = vpop.f32.mrf.mxu1  ;;  %v574_v31 = vadd.f32 %v573_v22, %v150_v28 }
  0xa1   :  { %v587_v32 = vadd.f32 %v586_v23, %v574_v31 }
  0xa6   :  { %v599_v24 = vpop.f32.mrf.mxu2  ;;  %v575_v26 = vpop.f32.mrf.mxu0 }
  0xa7   :  { %v612_v25 = vpop.f32.mrf.mxu3  ;;  %v588_v27 = vpop.f32.mrf.mxu1  ;;  %v600_v33 = vadd.f32 %v599_v24, %v587_v32 }
  0xa9   :  { %v613_v34 = vadd.f32 %v612_v25, %v600_v33 }
  0xae   :  { %v601_v29 = vpop.f32.mrf.mxu2 }
  0xaf   :  { %v614_v30 = vpop.f32.mrf.mxu3 }
  0xbe   :  { %v625_v35 = vpop.f32.mrf.mxu0 }
  0xbf   :  { %v638_v36 = vpop.f32.mrf.mxu1  ;;  %v626_v37 = vadd.f32 %v625_v35, %v613_v34 }
  0xc1   :  { %v639_v38 = vadd.f32 %v638_v36, %v626_v37 }
  0xc6   :  { %v651_v39 = vpop.f32.mrf.mxu2  ;;  %v627_v42 = vpop.f32.mrf.mxu0 }
  0xc7   :  { %v664_v40 = vpop.f32.mrf.mxu3  ;;  %v652_v41 = vadd.f32 %v651_v39, %v639_v38  ;;  %v640_v43 = vpop.f32.mrf.mxu1 }
  0xc9   :  { %v665_v44 = vadd.f32 %v664_v40, %v652_v41 }
  0xcb   :  { %668 = vst [vmem:[%s1229_s3] sm:$0xff] %v665_v44 }
  0xce   :  { %v653_v45 = vpop.f32.mrf.mxu2 }
  0xcf   :  { %v666_v46 = vpop.f32.mrf.mxu3 }

</bundles_post_ra>
